<compile_context>
chip_gen: v7x
topology: tpu7x:2x2x1
jax: 0.10.0
libtpu: 0.0.40
codegen_flags: <defaults>
</compile_context>

<pallas_src>
import functools

import jax
import jax.numpy as jnp
import numpy as np
from jax.experimental import pallas as pl
from jax.experimental.pallas import tpu as pltpu

BN_EPS = 1e-5          # PyTorch BatchNorm2d default eps


# --------------------------------------------------------------------------
# Fused kernel: attention weighting + 1x1 fusion conv (MXU) + bn + relu
# --------------------------------------------------------------------------
def attention_fusion_kernel(x1_ref, x2_ref, ch_ref, pc_ref, wf1_ref, wf2_ref,
                            o1_ref, o2_ref, *, c, h, w, b_tile):
    hw = h * w

    # ---- parameters, loaded/sliced ONCE per grid step (hoisted broadcasts) ----
    pc = pc_ref[...]                                    # (2C, 8), channel on sublanes
    a2, m2, b2 = pc[:, 0:1], pc[:, 1:2], pc[:, 2:3]     # height-attn (conv_height+bn2)
    a3, m3, b3 = pc[:, 3:4], pc[:, 4:5], pc[:, 5:6]     # width-attn  (conv_width +bn3)
    sf, tf = pc[:, 6:7], pc[:, 7:8]                     # fused-BN scale / shift
    half_params = ((a2[:c], m2[:c], b2[:c], a3[:c], m3[:c], b3[:c]),
                   (a2[c:], m2[c:], b2[c:], a3[c:], m3[c:], b3[c:]))
    wf1 = wf1_ref[...].astype(jnp.float32)              # (2C, C) fusion weights, x1 half
    wf2 = wf2_ref[...].astype(jnp.float32)              # (2C, C) fusion weights, x2 half
    ca_a, ca_m, ca_b = ch_ref[0], ch_ref[1], ch_ref[2]  # channel-attn scalars (bn1 folded)

    def spatial_attention(x_flat, prm):
        """Height x width attention map for one half, returned lane-dense (C, H*W)."""
        a2h, m2h, b2h, a3h, m3h, b3h = prm
        x3d = x_flat.reshape(c, h, w)                   # (C,H,W) view for pooled stats
        avg_h = jnp.mean(x3d, axis=2)                   # (C, H)  lane reduce over W
        max_h = jnp.max(x3d, axis=2)
        ha = jax.nn.sigmoid(avg_h * a2h + max_h * m2h + b2h)
        avg_w = jnp.mean(x3d, axis=1)                   # (C, W)  sublane reduce over H
        max_w = jnp.max(x3d, axis=1)
        wa = jax.nn.sigmoid(avg_w * a3h + max_w * m3h + b3h)
        return (ha[:, :, None] * wa[:, None, :]).reshape(c, hw)

    for b in range(b_tile):                             # static, small batch tile
        x1 = x1_ref[b].astype(jnp.float32)              # (C, HW) lane-dense slabs
        x2 = x2_ref[b].astype(jnp.float32)

        # ---- channel attention, directly on the flat slabs (sublane reduce) ----
        sum_c = (jnp.sum(x1, axis=0, keepdims=True)
                 + jnp.sum(x2, axis=0, keepdims=True))                  # (1, HW)
        max_c = jnp.maximum(jnp.max(x1, axis=0, keepdims=True),
                            jnp.max(x2, axis=0, keepdims=True))         # (1, HW)
        ca = jax.nn.sigmoid(ca_a * sum_c + ca_m * max_c + ca_b)         # (1, HW)

        # ---- attention-weighted halves, all elementwise on the flat slab ----
        y1 = x1 * ca * spatial_attention(x1, half_params[0])            # (C, HW)
        y2 = x2 * ca * spatial_attention(x2, half_params[1])            # (C, HW)

        # ---- 1x1 fusion conv on the MXU (one dot per half, no concat),
        #      folded BN + ReLU, two unmasked lane-dense slab stores ----
        fused = (jnp.dot(wf1, y1, preferred_element_type=jnp.float32)
                 + jnp.dot(wf2, y2, preferred_element_type=jnp.float32))  # (2C, HW)
        fused = jnp.maximum(fused * sf + tf, 0.0)
        o1_ref[b] = fused[:c].astype(o1_ref.dtype)
        o2_ref[b] = fused[c:].astype(o2_ref.dtype)


# --------------------------------------------------------------------------
# Wrapper
# --------------------------------------------------------------------------
def bn_eval_affine(bn):
    s = bn["g"] / jnp.sqrt(bn["v"] + BN_EPS)
    return s, bn["b"] - bn["m"] * s


def _pick_b_tile(batch, c, hw, itemsize, target_bytes=2 << 20, max_unroll=8):
    """Largest batch tile with ~<=2 MiB per input buffer (v7x-safe with double
    buffering) that still leaves >=2 parallel grid steps to feed both v7x TCs."""
    per_elem = max(c * hw * itemsize, 1)
    bt = max(1, min(batch, target_bytes // per_elem, max_unroll))
    if batch >= 2:
        bt = min(bt, batch // 2)      # keep the parallel grid extent >= 2
    while batch % bt:
        bt -= 1
    return max(bt, 1)


def attention_fusion_forward(x1, x2, params, *, b_tile=None):
    B, C, H, W = x1.shape
    C2, HW = 2 * C, H * W

    # fold BN running stats (eval mode) and the 2->1 conv scalars
    s1, t1 = bn_eval_affine(params["bn1"])           # (1,)
    s2, t2 = bn_eval_affine(params["bn2"])           # (2C,)
    s3, t3 = bn_eval_affine(params["bn3"])           # (2C,)
    sf, tf = bn_eval_affine(params["bn"])            # (2C,)

    wc_a, wc_m = params["wc"][0], params["wc"][1]
    wh_a, wh_m = params["wh"][0], params["wh"][1]
    ww_a, ww_m = params["ww"][0], params["ww"][1]

    # channel-attention scalars: conv_channel + bn1 + 1/(2C) of the mean folded -> SMEM
    ch_scal = jnp.stack([wc_a * s1[0] / C2,
                         wc_m * s1[0],
                         t1[0]]).astype(jnp.float32)

    # packed per-channel params, sublane-major (2C, 8):
    #   [wh_a*s2, wh_m*s2, t2, ww_a*s3, ww_m*s3, t3, bn_scale, bn_shift]
    pc = jnp.stack([wh_a * s2, wh_m * s2, t2,
                    ww_a * s3, ww_m * s3, t3, sf, tf], axis=-1).astype(jnp.float32)

    wf = params["fusion_w"].astype(jnp.float32)       # (2C, 2C)
    wf1, wf2 = wf[:, :C], wf[:, C:]                   # pre-split per input half

    # lane-dense layout: flatten the spatial plane onto the lane axis (H*W = 256)
    x1f = x1.reshape(B, C, HW)
    x2f = x2.reshape(B, C, HW)

    if b_tile is None:
        b_tile = _pick_b_tile(B, C, HW, x1.dtype.itemsize)
    grid = (B // b_tile,)

    kernel = functools.partial(attention_fusion_kernel, c=C, h=H, w=W,
                               b_tile=b_tile)

    out1f, out2f = pl.pallas_call(
        kernel,
        out_shape=(jax.ShapeDtypeStruct((B, C, HW), x1.dtype),
                   jax.ShapeDtypeStruct((B, C, HW), x1.dtype)),
        grid=grid,
        in_specs=[
            pl.BlockSpec((b_tile, C, HW), lambda i: (i, 0, 0)),   # x1 (lane-dense)
            pl.BlockSpec((b_tile, C, HW), lambda i: (i, 0, 0)),   # x2 (lane-dense)
            pl.BlockSpec(memory_space=pltpu.MemorySpace.SMEM),    # channel-attn scalars
            pl.BlockSpec((C2, 8), lambda i: (0, 0)),              # packed per-ch params
            pl.BlockSpec((C2, C), lambda i: (0, 0)),              # fusion weights (x1 half)
            pl.BlockSpec((C2, C), lambda i: (0, 0)),              # fusion weights (x2 half)
        ],
        out_specs=(pl.BlockSpec((b_tile, C, HW), lambda i: (i, 0, 0)),
                   pl.BlockSpec((b_tile, C, HW), lambda i: (i, 0, 0))),
        compiler_params=pltpu.CompilerParams(
            dimension_semantics=("parallel",)),
    )(x1f, x2f, ch_scal, pc, wf1, wf2)

    return out1f.reshape(B, C, H, W), out2f.reshape(B, C, H, W)


# --------------------------------------------------------------------------
# Pure-JAX reference (same math, no Pallas) for a correctness check
# --------------------------------------------------------------------------
def reference_forward(x1, x2, params):
    xc = jnp.concatenate([x1, x2], axis=1)
    B, C2, H, W = xc.shape
    C = C2 // 2

    def bn(x, p):
        s = p["g"] / jnp.sqrt(p["v"] + BN_EPS)
        sh = p["b"] - p["m"] * s
        shp = (1, -1, 1, 1)
        return x * s.reshape(shp) + sh.reshape(shp)

    avg_c = jnp.mean(xc, axis=1, keepdims=True)
    max_c = jnp.max(xc, axis=1, keepdims=True)
    ca = jax.nn.sigmoid(bn(params["wc"][0] * avg_c + params["wc"][1] * max_c,
                           params["bn1"]))

    avg_h = jnp.mean(xc, axis=3, keepdims=True)
    max_h = jnp.max(xc, axis=3, keepdims=True)
    ha = jax.nn.sigmoid(bn(params["wh"][0] * avg_h + params["wh"][1] * max_h,
                           params["bn2"]))

    avg_w = jnp.mean(xc, axis=2, keepdims=True)
    max_w = jnp.max(xc, axis=2, keepdims=True)
    wa = jax.nn.sigmoid(bn(params["ww"][0] * avg_w + params["ww"][1] * max_w,
                           params["bn3"]))

    out = xc * ca * ha * wa
    fused = jnp.einsum("oi,bihw->bohw", params["fusion_w"], out,
                       precision="highest")
    fused = jnp.maximum(bn(fused, params["bn"]), 0.0)
    return fused[:, :C], fused[:, C:]


# --------------------------------------------------------------------------
# Deterministic parameter init (shapes implied by AttentionFusionModule)
# --------------------------------------------------------------------------
def make_params(key, c):
    c2 = 2 * c
    ks = jax.random.split(key, 8)

    def bn_init(k, n):
        k1, k2, k3, k4 = jax.random.split(k, 4)
        return dict(
            g=1.0 + 0.1 * jax.random.normal(k1, (n,)),
            b=0.1 * jax.random.normal(k2, (n,)),
            m=0.1 * jax.random.normal(k3, (n,)),
            v=0.5 + jax.random.uniform(k4, (n,)),
        )

    params = dict(
        wc=0.5 * jax.random.normal(ks[0], (2,)),   # conv_channel (1,2,1,1)
        wh=0.5 * jax.random.normal(ks[1], (2,)),   # conv_height  (1,2,1,1)
        ww=0.5 * jax.random.normal(ks[2], (2,)),   # conv_width   (1,2,1,1)
        fusion_w=jax.random.normal(ks[3], (c2, c2)) / jnp.sqrt(c2),
        bn1=bn_init(ks[4], 1),
        bn2=bn_init(ks[5], c2),
        bn3=bn_init(ks[6], c2),
        bn=bn_init(ks[7], c2),
    )
    return jax.tree.map(lambda a: a.astype(jnp.float32), params)


if __name__ == "__main__":
    B, C, H, W = 2, 4, 16, 16
    key = jax.random.PRNGKey(0)
    kx1, kx2, kp = jax.random.split(key, 3)
    x1 = jax.random.normal(kx1, (B, C, H, W), dtype=jnp.float32)
    x2 = jax.random.normal(kx2, (B, C, H, W), dtype=jnp.float32)
    params = make_params(kp, C)

    out1, out2 = attention_fusion_forward(x1, x2, params)
    out1, out2 = jax.block_until_ready((out1, out2))

    ref1, ref2 = reference_forward(x1, x2, params)
    ref1, ref2 = jax.block_until_ready((ref1, ref2))

    assert out1.shape == (B, C, H, W) and out2.shape == (B, C, H, W)
    np.testing.assert_allclose(np.asarray(out1), np.asarray(ref1),
                               rtol=1e-2, atol=1e-2)
    np.testing.assert_allclose(np.asarray(out2), np.asarray(ref2),
                               rtol=1e-2, atol=1e-2)
    print("KERNEL_OK")
</pallas_src>

<mosaic_0001>
module attributes {stable_mosaic.version = 11 : i64} {
  func.func @attention_fusion_kernel(%arg0: i32, %arg1: memref<1x4x256xf32, #tpu.memory_space<vmem>>, %arg2: memref<1x4x256xf32, #tpu.memory_space<vmem>>, %arg3: memref<3xf32, #tpu.memory_space<smem>>, %arg4: memref<8x8xf32, #tpu.memory_space<vmem>>, %arg5: memref<8x4xf32, #tpu.memory_space<vmem>>, %arg6: memref<8x4xf32, #tpu.memory_space<vmem>>, %arg7: memref<1x4x256xf32, #tpu.memory_space<vmem>>, %arg8: memref<1x4x256xf32, #tpu.memory_space<vmem>>) attributes {dimension_semantics = [#tpu.dimension_semantics<parallel>], iteration_bounds = array<i64: 2>, scalar_prefetch = 0 : i64, scratch_operands = 0 : i64, tpu.core_type = #tpu.core_type<tc>, window_params = [{transform_indices = @transform_0, window_bounds = array<i64: 1, 4, 256>}, {transform_indices = @transform_1, window_bounds = array<i64: 1, 4, 256>}, {transform_indices = @transform_2, window_bounds = array<i64: 3>}, {pipeline_mode = #tpu.pipeline_mode<synchronous>, transform_indices = @transform_3, window_bounds = array<i64: 8, 8>}, {pipeline_mode = #tpu.pipeline_mode<synchronous>, transform_indices = @transform_4, window_bounds = array<i64: 8, 4>}, {pipeline_mode = #tpu.pipeline_mode<synchronous>, transform_indices = @transform_5, window_bounds = array<i64: 8, 4>}, {transform_indices = @transform_6, window_bounds = array<i64: 1, 4, 256>}, {transform_indices = @transform_7, window_bounds = array<i64: 1, 4, 256>}]} {
    %c0 = arith.constant 0 : index
    %c0_0 = arith.constant 0 : index
    %0 = vector.load %arg4[%c0, %c0_0] : memref<8x8xf32, #tpu.memory_space<vmem>>, vector<8x8xf32>
    %1 = vector.extract_strided_slice %0 {offsets = [0, 0], sizes = [8, 1], strides = [1, 1]} : vector<8x8xf32> to vector<8x1xf32>
    %2 = vector.extract_strided_slice %0 {offsets = [0, 1], sizes = [8, 1], strides = [1, 1]} : vector<8x8xf32> to vector<8x1xf32>
    %3 = vector.extract_strided_slice %0 {offsets = [0, 2], sizes = [8, 1], strides = [1, 1]} : vector<8x8xf32> to vector<8x1xf32>
    %4 = vector.extract_strided_slice %0 {offsets = [0, 3], sizes = [8, 1], strides = [1, 1]} : vector<8x8xf32> to vector<8x1xf32>
    %5 = vector.extract_strided_slice %0 {offsets = [0, 4], sizes = [8, 1], strides = [1, 1]} : vector<8x8xf32> to vector<8x1xf32>
    %6 = vector.extract_strided_slice %0 {offsets = [0, 5], sizes = [8, 1], strides = [1, 1]} : vector<8x8xf32> to vector<8x1xf32>
    %7 = vector.extract_strided_slice %0 {offsets = [0, 6], sizes = [8, 1], strides = [1, 1]} : vector<8x8xf32> to vector<8x1xf32>
    %8 = vector.extract_strided_slice %0 {offsets = [0, 7], sizes = [8, 1], strides = [1, 1]} : vector<8x8xf32> to vector<8x1xf32>
    %9 = vector.extract_strided_slice %1 {offsets = [0, 0], sizes = [4, 1], strides = [1, 1]} : vector<8x1xf32> to vector<4x1xf32>
    %10 = vector.extract_strided_slice %2 {offsets = [0, 0], sizes = [4, 1], strides = [1, 1]} : vector<8x1xf32> to vector<4x1xf32>
    %11 = vector.extract_strided_slice %3 {offsets = [0, 0], sizes = [4, 1], strides = [1, 1]} : vector<8x1xf32> to vector<4x1xf32>
    %12 = vector.extract_strided_slice %4 {offsets = [0, 0], sizes = [4, 1], strides = [1, 1]} : vector<8x1xf32> to vector<4x1xf32>
    %13 = vector.extract_strided_slice %5 {offsets = [0, 0], sizes = [4, 1], strides = [1, 1]} : vector<8x1xf32> to vector<4x1xf32>
    %14 = vector.extract_strided_slice %6 {offsets = [0, 0], sizes = [4, 1], strides = [1, 1]} : vector<8x1xf32> to vector<4x1xf32>
    %15 = vector.extract_strided_slice %1 {offsets = [4, 0], sizes = [4, 1], strides = [1, 1]} : vector<8x1xf32> to vector<4x1xf32>
    %16 = vector.extract_strided_slice %2 {offsets = [4, 0], sizes = [4, 1], strides = [1, 1]} : vector<8x1xf32> to vector<4x1xf32>
    %17 = vector.extract_strided_slice %3 {offsets = [4, 0], sizes = [4, 1], strides = [1, 1]} : vector<8x1xf32> to vector<4x1xf32>
    %18 = vector.extract_strided_slice %4 {offsets = [4, 0], sizes = [4, 1], strides = [1, 1]} : vector<8x1xf32> to vector<4x1xf32>
    %19 = vector.extract_strided_slice %5 {offsets = [4, 0], sizes = [4, 1], strides = [1, 1]} : vector<8x1xf32> to vector<4x1xf32>
    %20 = vector.extract_strided_slice %6 {offsets = [4, 0], sizes = [4, 1], strides = [1, 1]} : vector<8x1xf32> to vector<4x1xf32>
    %c0_1 = arith.constant 0 : index
    %c0_2 = arith.constant 0 : index
    %21 = vector.load %arg5[%c0_1, %c0_2] : memref<8x4xf32, #tpu.memory_space<vmem>>, vector<8x4xf32>
    %c0_3 = arith.constant 0 : index
    %c0_4 = arith.constant 0 : index
    %22 = vector.load %arg6[%c0_3, %c0_4] : memref<8x4xf32, #tpu.memory_space<vmem>>, vector<8x4xf32>
    %c0_5 = arith.constant 0 : index
    %23 = memref.load %arg3[%c0_5] : memref<3xf32, #tpu.memory_space<smem>>
    %c1 = arith.constant 1 : index
    %24 = memref.load %arg3[%c1] : memref<3xf32, #tpu.memory_space<smem>>
    %c2 = arith.constant 2 : index
    %25 = memref.load %arg3[%c2] : memref<3xf32, #tpu.memory_space<smem>>
    %c0_6 = arith.constant 0 : index
    %c0_7 = arith.constant 0 : index
    %c0_8 = arith.constant 0 : index
    %26 = vector.load %arg1[%c0_6, %c0_7, %c0_8] : memref<1x4x256xf32, #tpu.memory_space<vmem>>, vector<1x4x256xf32>
    %27 = vector.shape_cast %26 : vector<1x4x256xf32> to vector<4x256xf32>
    %c0_9 = arith.constant 0 : index
    %c0_10 = arith.constant 0 : index
    %c0_11 = arith.constant 0 : index
    %28 = vector.load %arg2[%c0_9, %c0_10, %c0_11] : memref<1x4x256xf32, #tpu.memory_space<vmem>>, vector<1x4x256xf32>
    %29 = vector.shape_cast %28 : vector<1x4x256xf32> to vector<4x256xf32>
    %cst = arith.constant dense<0.000000e+00> : vector<256xf32>
    %30 = vector.multi_reduction <add>, %27, %cst [0] : vector<4x256xf32> to vector<256xf32>
    %31 = vector.shape_cast %30 : vector<256xf32> to vector<1x256xf32>
    %cst_12 = arith.constant dense<0.000000e+00> : vector<256xf32>
    %32 = vector.multi_reduction <add>, %29, %cst_12 [0] : vector<4x256xf32> to vector<256xf32>
    %33 = vector.shape_cast %32 : vector<256xf32> to vector<1x256xf32>
    %34 = arith.addf %31, %33 : vector<1x256xf32>
    %cst_13 = arith.constant dense<0xFF800000> : vector<256xf32>
    %35 = vector.multi_reduction <maximumf>, %27, %cst_13 [0] : vector<4x256xf32> to vector<256xf32>
    %36 = vector.shape_cast %35 : vector<256xf32> to vector<1x256xf32>
    %cst_14 = arith.constant dense<0xFF800000> : vector<256xf32>
    %37 = vector.multi_reduction <maximumf>, %29, %cst_14 [0] : vector<4x256xf32> to vector<256xf32>
    %38 = vector.shape_cast %37 : vector<256xf32> to vector<1x256xf32>
    %39 = arith.maximumf %36, %38 : vector<1x256xf32>
    %40 = vector.broadcast %23 : f32 to vector<1x256xf32>
    %41 = arith.mulf %40, %34 : vector<1x256xf32>
    %42 = vector.broadcast %24 : f32 to vector<1x256xf32>
    %43 = arith.mulf %42, %39 : vector<1x256xf32>
    %44 = arith.addf %41, %43 : vector<1x256xf32>
    %45 = vector.broadcast %25 : f32 to vector<1x256xf32>
    %46 = arith.addf %44, %45 : vector<1x256xf32>
    %47 = arith.negf %46 : vector<1x256xf32>
    %48 = math.exp %47 : vector<1x256xf32>
    %cst_15 = arith.constant 1.000000e+00 : f32
    %49 = vector.broadcast %cst_15 : f32 to vector<1x256xf32>
    %50 = arith.addf %49, %48 : vector<1x256xf32>
    %51 = arith.divf %49, %50 : vector<1x256xf32>
    %52 = vector.broadcast %51 : vector<1x256xf32> to vector<4x256xf32>
    %53 = arith.mulf %27, %52 : vector<4x256xf32>
    %54 = vector.shape_cast %27 : vector<4x256xf32> to vector<4x16x16xf32>
    %cst_16 = arith.constant dense<0.000000e+00> : vector<4x16xf32>
    %55 = vector.multi_reduction <add>, %54, %cst_16 [2] : vector<4x16x16xf32> to vector<4x16xf32>
    %cst_17 = arith.constant 1.600000e+01 : f32
    %56 = vector.broadcast %cst_17 : f32 to vector<4x16xf32>
    %57 = arith.divf %55, %56 : vector<4x16xf32>
    %cst_18 = arith.constant dense<0xFF800000> : vector<4x16xf32>
    %58 = vector.multi_reduction <maximumf>, %54, %cst_18 [2] : vector<4x16x16xf32> to vector<4x16xf32>
    %59 = vector.broadcast %9 : vector<4x1xf32> to vector<4x16xf32>
    %60 = arith.mulf %57, %59 : vector<4x16xf32>
    %61 = vector.broadcast %10 : vector<4x1xf32> to vector<4x16xf32>
    %62 = arith.mulf %58, %61 : vector<4x16xf32>
    %63 = arith.addf %60, %62 : vector<4x16xf32>
    %64 = vector.broadcast %11 : vector<4x1xf32> to vector<4x16xf32>
    %65 = arith.addf %63, %64 : vector<4x16xf32>
    %66 = arith.negf %65 : vector<4x16xf32>
    %67 = math.exp %66 : vector<4x16xf32>
    %cst_19 = arith.constant 1.000000e+00 : f32
    %68 = vector.broadcast %cst_19 : f32 to vector<4x16xf32>
    %69 = arith.addf %68, %67 : vector<4x16xf32>
    %70 = arith.divf %68, %69 : vector<4x16xf32>
    %cst_20 = arith.constant dense<0.000000e+00> : vector<4x16xf32>
    %71 = vector.multi_reduction <add>, %54, %cst_20 [1] : vector<4x16x16xf32> to vector<4x16xf32>
    %cst_21 = arith.constant 1.600000e+01 : f32
    %72 = vector.broadcast %cst_21 : f32 to vector<4x16xf32>
    %73 = arith.divf %71, %72 : vector<4x16xf32>
    %cst_22 = arith.constant dense<0xFF800000> : vector<4x16xf32>
    %74 = vector.multi_reduction <maximumf>, %54, %cst_22 [1] : vector<4x16x16xf32> to vector<4x16xf32>
    %75 = vector.broadcast %12 : vector<4x1xf32> to vector<4x16xf32>
    %76 = arith.mulf %73, %75 : vector<4x16xf32>
    %77 = vector.broadcast %13 : vector<4x1xf32> to vector<4x16xf32>
    %78 = arith.mulf %74, %77 : vector<4x16xf32>
    %79 = arith.addf %76, %78 : vector<4x16xf32>
    %80 = vector.broadcast %14 : vector<4x1xf32> to vector<4x16xf32>
    %81 = arith.addf %79, %80 : vector<4x16xf32>
    %82 = arith.negf %81 : vector<4x16xf32>
    %83 = math.exp %82 : vector<4x16xf32>
    %cst_23 = arith.constant 1.000000e+00 : f32
    %84 = vector.broadcast %cst_23 : f32 to vector<4x16xf32>
    %85 = arith.addf %84, %83 : vector<4x16xf32>
    %86 = arith.divf %84, %85 : vector<4x16xf32>
    %87 = vector.shape_cast %70 : vector<4x16xf32> to vector<4x16x1xf32>
    %88 = vector.shape_cast %86 : vector<4x16xf32> to vector<4x1x16xf32>
    %89 = vector.broadcast %87 : vector<4x16x1xf32> to vector<4x16x16xf32>
    %90 = vector.broadcast %88 : vector<4x1x16xf32> to vector<4x16x16xf32>
    %91 = arith.mulf %89, %90 : vector<4x16x16xf32>
    %92 = vector.shape_cast %91 : vector<4x16x16xf32> to vector<4x256xf32>
    %93 = arith.mulf %53, %92 : vector<4x256xf32>
    %94 = vector.broadcast %51 : vector<1x256xf32> to vector<4x256xf32>
    %95 = arith.mulf %29, %94 : vector<4x256xf32>
    %96 = vector.shape_cast %29 : vector<4x256xf32> to vector<4x16x16xf32>
    %cst_24 = arith.constant dense<0.000000e+00> : vector<4x16xf32>
    %97 = vector.multi_reduction <add>, %96, %cst_24 [2] : vector<4x16x16xf32> to vector<4x16xf32>
    %cst_25 = arith.constant 1.600000e+01 : f32
    %98 = vector.broadcast %cst_25 : f32 to vector<4x16xf32>
    %99 = arith.divf %97, %98 : vector<4x16xf32>
    %cst_26 = arith.constant dense<0xFF800000> : vector<4x16xf32>
    %100 = vector.multi_reduction <maximumf>, %96, %cst_26 [2] : vector<4x16x16xf32> to vector<4x16xf32>
    %101 = vector.broadcast %15 : vector<4x1xf32> to vector<4x16xf32>
    %102 = arith.mulf %99, %101 : vector<4x16xf32>
    %103 = vector.broadcast %16 : vector<4x1xf32> to vector<4x16xf32>
    %104 = arith.mulf %100, %103 : vector<4x16xf32>
    %105 = arith.addf %102, %104 : vector<4x16xf32>
    %106 = vector.broadcast %17 : vector<4x1xf32> to vector<4x16xf32>
    %107 = arith.addf %105, %106 : vector<4x16xf32>
    %108 = arith.negf %107 : vector<4x16xf32>
    %109 = math.exp %108 : vector<4x16xf32>
    %cst_27 = arith.constant 1.000000e+00 : f32
    %110 = vector.broadcast %cst_27 : f32 to vector<4x16xf32>
    %111 = arith.addf %110, %109 : vector<4x16xf32>
    %112 = arith.divf %110, %111 : vector<4x16xf32>
    %cst_28 = arith.constant dense<0.000000e+00> : vector<4x16xf32>
    %113 = vector.multi_reduction <add>, %96, %cst_28 [1] : vector<4x16x16xf32> to vector<4x16xf32>
    %cst_29 = arith.constant 1.600000e+01 : f32
    %114 = vector.broadcast %cst_29 : f32 to vector<4x16xf32>
    %115 = arith.divf %113, %114 : vector<4x16xf32>
    %cst_30 = arith.constant dense<0xFF800000> : vector<4x16xf32>
    %116 = vector.multi_reduction <maximumf>, %96, %cst_30 [1] : vector<4x16x16xf32> to vector<4x16xf32>
    %117 = vector.broadcast %18 : vector<4x1xf32> to vector<4x16xf32>
    %118 = arith.mulf %115, %117 : vector<4x16xf32>
    %119 = vector.broadcast %19 : vector<4x1xf32> to vector<4x16xf32>
    %120 = arith.mulf %116, %119 : vector<4x16xf32>
    %121 = arith.addf %118, %120 : vector<4x16xf32>
    %122 = vector.broadcast %20 : vector<4x1xf32> to vector<4x16xf32>
    %123 = arith.addf %121, %122 : vector<4x16xf32>
    %124 = arith.negf %123 : vector<4x16xf32>
    %125 = math.exp %124 : vector<4x16xf32>
    %cst_31 = arith.constant 1.000000e+00 : f32
    %126 = vector.broadcast %cst_31 : f32 to vector<4x16xf32>
    %127 = arith.addf %126, %125 : vector<4x16xf32>
    %128 = arith.divf %126, %127 : vector<4x16xf32>
    %129 = vector.shape_cast %112 : vector<4x16xf32> to vector<4x16x1xf32>
    %130 = vector.shape_cast %128 : vector<4x16xf32> to vector<4x1x16xf32>
    %131 = vector.broadcast %129 : vector<4x16x1xf32> to vector<4x16x16xf32>
    %132 = vector.broadcast %130 : vector<4x1x16xf32> to vector<4x16x16xf32>
    %133 = arith.mulf %131, %132 : vector<4x16x16xf32>
    %134 = vector.shape_cast %133 : vector<4x16x16xf32> to vector<4x256xf32>
    %135 = arith.mulf %95, %134 : vector<4x256xf32>
    %cst_32 = arith.constant dense<0.000000e+00> : vector<8x256xf32>
    %136 = tpu.matmul %21, %93, %cst_32 {dimension_numbers = #tpu.dot_dimension_numbers<[1], [0], [0], [1], [0, 0, 1, 1], [], []>} : vector<8x4xf32>, vector<4x256xf32>, vector<8x256xf32> -> vector<8x256xf32>
    %cst_33 = arith.constant dense<0.000000e+00> : vector<8x256xf32>
    %137 = tpu.matmul %22, %135, %cst_33 {dimension_numbers = #tpu.dot_dimension_numbers<[1], [0], [0], [1], [0, 0, 1, 1], [], []>} : vector<8x4xf32>, vector<4x256xf32>, vector<8x256xf32> -> vector<8x256xf32>
    %138 = arith.addf %136, %137 : vector<8x256xf32>
    %139 = vector.broadcast %7 : vector<8x1xf32> to vector<8x256xf32>
    %140 = arith.mulf %138, %139 : vector<8x256xf32>
    %141 = vector.broadcast %8 : vector<8x1xf32> to vector<8x256xf32>
    %142 = arith.addf %140, %141 : vector<8x256xf32>
    %cst_34 = arith.constant 0.000000e+00 : f32
    %143 = vector.broadcast %cst_34 : f32 to vector<8x256xf32>
    %144 = arith.maximumf %142, %143 : vector<8x256xf32>
    %145 = vector.extract_strided_slice %144 {offsets = [0, 0], sizes = [4, 256], strides = [1, 1]} : vector<8x256xf32> to vector<4x256xf32>
    %c0_35 = arith.constant 0 : index
    %c0_36 = arith.constant 0 : index
    %c0_37 = arith.constant 0 : index
    %146 = vector.load %arg7[%c0_35, %c0_36, %c0_37] : memref<1x4x256xf32, #tpu.memory_space<vmem>>, vector<1x4x256xf32>
    %147 = vector.shape_cast %146 : vector<1x4x256xf32> to vector<4x256xf32>
    %148 = vector.shape_cast %145 : vector<4x256xf32> to vector<1x4x256xf32>
    tpu.vector_store %arg7[%c0_35, %c0_36, %c0_37], %148 {strides = array<i32>} : memref<1x4x256xf32, #tpu.memory_space<vmem>>, vector<1x4x256xf32>,
    %149 = vector.extract_strided_slice %144 {offsets = [4, 0], sizes = [4, 256], strides = [1, 1]} : vector<8x256xf32> to vector<4x256xf32>
    %c0_38 = arith.constant 0 : index
    %c0_39 = arith.constant 0 : index
    %c0_40 = arith.constant 0 : index
    %150 = vector.load %arg8[%c0_38, %c0_39, %c0_40] : memref<1x4x256xf32, #tpu.memory_space<vmem>>, vector<1x4x256xf32>
    %151 = vector.shape_cast %150 : vector<1x4x256xf32> to vector<4x256xf32>
    %152 = vector.shape_cast %149 : vector<4x256xf32> to vector<1x4x256xf32>
    tpu.vector_store %arg8[%c0_38, %c0_39, %c0_40], %152 {strides = array<i32>} : memref<1x4x256xf32, #tpu.memory_space<vmem>>, vector<1x4x256xf32>,
    return
  }
  func.func @transform_0(%arg0: i32) -> (i32, i32, i32) {
    %c0_i32 = arith.constant 0 : i32
    %c0_i32_0 = arith.constant 0 : i32
    %c0_i32_1 = arith.constant 0 : i32
    return %arg0, %c0_i32, %c0_i32_0 : i32, i32, i32
  }
  func.func @transform_1(%arg0: i32) -> (i32, i32, i32) {
    %c0_i32 = arith.constant 0 : i32
    %c0_i32_0 = arith.constant 0 : i32
    %c0_i32_1 = arith.constant 0 : i32
    return %arg0, %c0_i32, %c0_i32_0 : i32, i32, i32
  }
  func.func @transform_2(%arg0: i32) -> i32 {
    %c0_i32 = arith.constant 0 : i32
    %c0_i32_0 = arith.constant 0 : i32
    return %c0_i32 : i32
  }
  func.func @transform_3(%arg0: i32) -> (i32, i32) {
    %c0_i32 = arith.constant 0 : i32
    %c0_i32_0 = arith.constant 0 : i32
    %c0_i32_1 = arith.constant 0 : i32
    return %c0_i32, %c0_i32_0 : i32, i32
  }
  func.func @transform_4(%arg0: i32) -> (i32, i32) {
    %c0_i32 = arith.constant 0 : i32
    %c0_i32_0 = arith.constant 0 : i32
    %c0_i32_1 = arith.constant 0 : i32
    return %c0_i32, %c0_i32_0 : i32, i32
  }
  func.func @transform_5(%arg0: i32) -> (i32, i32) {
    %c0_i32 = arith.constant 0 : i32
    %c0_i32_0 = arith.constant 0 : i32
    %c0_i32_1 = arith.constant 0 : i32
    return %c0_i32, %c0_i32_0 : i32, i32
  }
  func.func @transform_6(%arg0: i32) -> (i32, i32, i32) {
    %c0_i32 = arith.constant 0 : i32
    %c0_i32_0 = arith.constant 0 : i32
    %c0_i32_1 = arith.constant 0 : i32
    return %arg0, %c0_i32, %c0_i32_0 : i32, i32, i32
  }
  func.func @transform_7(%arg0: i32) -> (i32, i32, i32) {
    %c0_i32 = arith.constant 0 : i32
    %c0_i32_0 = arith.constant 0 : i32
    %c0_i32_1 = arith.constant 0 : i32
    return %arg0, %c0_i32, %c0_i32_0 : i32, i32, i32
  }
}

</mosaic_0001>

<bundles_post_ra>
// kernel: tpu_custom_call.1
= control target key start
LH: loop header
LB: loop body
LE: loop exit
PB: predicated region body
PF: predicated region fallthrough
CT: control target
= control target key end

     0   :  { %13 = vsyncpa [#allocation3], 0  ;;  %s3867_s0 = inlined_call_operand.vmem [shape: f32[2,4,256], index: 0, kind: input, shape index: {}]   ;;  %s3868_s1 = inlined_call_operand.hbm [shape: f32[2,4,256], index: 1, kind: input, shape index: {}]   ;;  %s3869_s2 = inlined_call_operand.vmem [shape: f32[3], index: 2, kind: input, shape index: {}]   ;;  %s3870_s3 = inlined_call_operand.vmem [shape: f32[8,8], index: 3, kind: input, shape index: {}]   ;;  %s3871_s4 = inlined_call_operand.vmem [shape: f32[8,4], index: 4, kind: input, shape index: {}]   ;;  %s3872_s5 = inlined_call_operand.vmem [shape: f32[8,4], index: 5, kind: input, shape index: {}]   ;;  %s3873_s6 = inlined_call_operand.hbm [shape: f32[2,4,256], index: 6, kind: output, shape index: {0}]   ;;  %s3874_s7 = inlined_call_operand.hbm [shape: f32[2,4,256], index: 7, kind: output, shape index: {1}]  }
   0x1   :  { %15 = vsyncpa [#allocation3 + $0x1], 0 }
   0x2   :  { %16 = vsyncpa [#allocation5], 0 }
   0x3   :  { %17 = vsyncpa [#allocation4], 0 }
   0x4   :  { %19 = vsyncpa [#allocation4 + $0x1], 0 }
   0x5   :  { %20 = vsyncpa [#allocation9], 0 }
   0x6   :  { %22 = vsyncpa [#allocation9 + $0x1], 0  ;;  %s2891_s24 = smov 0   ;;  %s2893_s25 = smov 0  }
   0x7   :  { %s2895_s26 = smov 0   ;;  %s2897_s27 = smov 0  }
   0x8 LB: > { %s2912_s28 = sadd.s32 4294967295, %s2827_s27   ;;  %s2411_s29 = sadd.s32 4294967294, %s2827_s27   ;;  %s2827_s27 = sphi %s2897_s27, %s3957_s27   ;;  %s2823_s26 = sphi %s2895_s26, %s3956_s26   ;;  %s2819_s25 = sphi %s2893_s25, %s3955_s25   ;;  %s2815_s24 = sphi %s2891_s24, %s3954_s24  }
   0x9   : > { %p74_p0 = scmp.ne.s32.totalorder %s2819_s25, %s2815_s24  ;;  %p3875_p1 = scmp.eq.s32.totalorder %s2912_s28, 0 }
   0xa   : > { %p188_p3 = scmp.eq.s32.totalorder %s2411_s29, 1  ;;  %p2412_p5 = scmp.ge.s32.totalorder %s2827_s27, 1 }
   0xb   : > { %p2921_p4 = por %p3875_p1, %p74_p0  ;;  %p221_p7 = scmp.lt.s32.totalorder %s2827_s27, 3 }
   0xc   : > { %p2926_p6 = por %p188_p3, %p74_p0  ;;  %s234_s11 = sshll.u32 %s3869_s2, 4  ;;  %s235_s11 = int_to_ptr.vmem [resolvable:$true] %s234_s11 }
   0xd   : > { %s3884_s30 = scalar_select %p2921_p4, 1, 0 }
   0xe   : > { %s3885_s8 = scalar_select %p2926_p6, 1, 0 }
   0xf   : > { %p2934_p8 = pnand %p2412_p5, %p221_p7  ;;  %s2942_s13 = sadd.s32 1, %s2827_s27  }
  0x10   : > { %s58_s15 = ssub.s32 %s2827_s27, %s2942_s13  ;;  %s61_s17 = sadd.s32 1, %s2823_s26 }
  0x11   : > { %p2491_p10 = pneg %p2934_p8  ;;  %p2952_p12 = scmp.eq.s32.totalorder %s58_s15, 0 }
  0x12   : > { %p68_p13 = scmp.ne.s32.totalorder %s2823_s26, %s2819_s25  ;;  %s2680_s18 = scalar_lea.vmem %s235_s11, 16 }
  0x13   : > { %p2946_p11 = pnand %p2491_p10, %p3875_p1  ;;  %p2681_p0 = scmp.ne.s32.totalorder %s235_s11, %s2680_s18 }
  0x14   : > { %p2688_p9 = scmp.lt.s32.totalorder %s235_s11, %s235_s11  ;;  %p2689_p2 = scmp.lt.s32.totalorder %s2680_s18, %s2680_s18 }
  0x15   : > { %p2682_p3 = pneg %p2946_p11 }
  0x16   : > { %p2690_p10 = por %p2689_p2, %p2688_p9 }
  0x17   : > { %p2683_p5 = pnand %p2682_p3, %p2681_p0 }
  0x19   : > { %p2684_p7 = pneg %p2683_p5 }
  0x1b   : > { %p2691_p1 = pnand %p2690_p10, %p2684_p7 }
  0x1d   : > { %2694 = shalt.err (!%p2691_p1)
}
  0x1e   : > { %s2829_s19 = smov [#allocation6]   ;;  %p69_p2 = scmp.eq.s32.totalorder %s2827_s27, 0 }
  0x1f   : > { %2494 = dma.vmem_to_smem (!%p2946_p11), %s235_s11, 16, %s2829_s19, [#allocation5]  }
  0x20   : > { %s2966_s20 = scalar_select %p2952_p12, %s2823_s26, %s61_s17  }
  0x21   : > { %p3889_p1 = scmp.eq.s32.totalorder %s2912_s28, 1  ;;  %p2507_p0 = scmp.lt.s32.totalorder %s2827_s27, 2 }
  0x22   : > { %s262_s22 = sand.u32 1, %s2823_s26   ;;  %p70_p3 = por %p69_p2, %p68_p13 }
  0x23   : > { %p2974_p9 = por %p3889_p1, %p68_p13  ;;  %s2415_s23 = sshll.u32 %s262_s22, 3 }
  0x24   : > { %s2475_s29 = sshll.u32 %s2827_s27, 7  ;;  %s266_s14 = scalar_lea.vmem [#allocation2], %s2415_s23 }
  0x25   : > { %s3890_s21 = scalar_select %p2974_p9, 1, 0 }
  0x26   : > { %s2987_s11 = scalar_lea.hbm %s3868_s1, %s2475_s29  ;;  %s274_s15 = sshll.u32 %s266_s14, 4  ;;  %s2993_s15 = int_to_ptr.vmem [resolvable:$true] %s274_s15 }
  0x27   : > { %p2989_p11 = pnand %p2507_p0, %p70_p3  ;;  %s263_s17 = scalar_lea.sflag [#allocation3], %s262_s22 }
  0x28   : > { %s2695_s18 = scalar_lea.hbm %s2987_s11, 128  ;;  %s2700_s29 = scalar_lea.hbm %s3868_s1, 256 }
  0x29   : > { %p2696_p12 = scmp.ne.s32.totalorder %s2987_s11, %s2695_s18  ;;  %p2697_p13 = pneg %p2989_p11 }
  0x2a   : > { %p2701_p10 = scmp.lt.u32.totalorder %s2987_s11, %s3868_s1  ;;  %p2702_p2 = scmp.lt.u32.totalorder %s2700_s29, %s2695_s18 }
  0x2b   : > { %p2698_p5 = pnand %p2697_p13, %p2696_p12  ;;  %p2704_p0 = scmp.lt.u32.totalorder %s2695_s18, %s2987_s11 }
  0x2c   : > { %p2703_p1 = por %p2702_p2, %p2701_p10 }
  0x2d   : > { %p2699_p7 = pneg %p2698_p5 }
  0x2e   : > { %p2705_p3 = por %p2704_p0, %p2703_p1 }
  0x30   : > { %p2706_p6 = pnand %p2705_p3, %p2699_p7 }
  0x32   : > { %2709 = shalt.err (!%p2706_p6)
}
  0x33   : > { %s2710_s22 = scalar_lea.vmem %s2993_s15, 128  ;;  %s2830_s14 = smov [#allocation2]  }
  0x34   : > { %p2711_p12 = scmp.ne.s32.totalorder %s2993_s15, %s2710_s22  ;;  %s2715_s19 = sshll.u32 %s2830_s14, 4  ;;  %s2716_s19 = int_to_ptr.vmem [resolvable:$false] %s2715_s19 }
  0x35   : > { %s2717_s23 = scalar_lea.vmem %s2716_s19, 256  ;;  %p2718_p4 = scmp.lt.s32.totalorder %s2993_s15, %s2716_s19 }
  0x36   : > { %p2713_p5 = pnand %p2711_p12, %p2697_p13  ;;  %p2719_p10 = scmp.lt.s32.totalorder %s2717_s23, %s2710_s22 }
  0x38   : > { %p2714_p9 = pneg %p2713_p5  ;;  %p2720_p2 = por %p2719_p10, %p2718_p4 }
  0x3a   : > { %p2721_p1 = pnand %p2720_p2, %p2714_p9 }
  0x3c   : > { %2724 = shalt.err (!%p2721_p1)
}
  0x3d   : > { %2498 = dma.hbm_to_vmem [thread:$0]  (!%p2989_p11), %s2987_s11, 128, %s2993_s15, %s263_s17  }
  0x3e   : > { %283 = sbr.rel (%p2934_p8) target bundleno = 1102 (0x44e), region = 44 }
  0x45   : > { %s3023_s18 = sand.u32 1, %s2819_s25   ;;  %p3892_p4 = scmp.ne.s32.totalorder %s3884_s30, 0 }
  0x46   : > { %s3026_s29 = sshll.u32 %s3023_s18, 3  ;;  %s286_s9 = scalar_lea.sflag [#allocation3], %s3023_s18 }
  0x47   : > { %s289_s10 = scalar_lea.vmem [#allocation2], %s3026_s29 }
  0x48   : > { %2798 = dma.done.wait (%p3892_p4), %s286_s9, 128  }
  0x49   : > { %2800 = vsyncadd (%p3892_p4), %s286_s9, 4294967168  ;;  %p3893_p6 = scmp.eq.s32.totalorder %s2912_s28, 0 }
  0x4b   : > { %2802 = dma.done.wait (%p3893_p6), [#allocation5], 16   ;;  %p3894_p8 = pmov %p3893_p6 }
  0x4d   : > { %2804 = vsyncadd (%p3894_p8), [#allocation5], 4294967280 }
  0x4e   : > { %298 = sfence }
  0x4f   : > { %p335_p9 = scmp.lt.s32.totalorder %s2912_s28, 1  ;;  %v2831_v0 = vmov 0   ;;  %s2832_s17 = smov 80   ;;  %v3055_v2 = vld [vmem:[%s289_s10] sm:$0xff]  ;;  %v2839_v4 = vmov 2   ;;  %v2840_v5 = vmov 1   ;;  %v484_v10 = vlaneseq }
  0x50   : > { %2561 = vset.pattern.permute.xlu1 %v2831_v0  ;;  %s2833_s22 = smov 112   ;;  %s2834_s14 = smov 64   ;;  %v3075_v3 = vld [vmem:[%s3870_s3] sm:$0xff]  ;;  %2562 = vset.pattern.permute.xlu0 %v2840_v5  ;;  %v2841_v8 = vmov 1983009808   ;;  %v1268_v45 = vrot.slane %v3055_v2, 4 }
  0x51   : > { %s336_s12 = scalar_select %p335_p9, %s2912_s28, 1  ;;  %v482_v9 = vunpack.c.l.s4 %v2841_v8  ;;  %v3078_v14 = vshrl.u32 %v484_v10, 7  ;;  %v2842_v20 = vmov 1934713408   ;;  %vm648_vm0 = vcmask 130048  }
  0x52   : > { %s2835_s19 = smov 96   ;;  %s2836_s23 = smov 32   ;;  %v499_v21 = vunpack.c.l.s4 %v2842_v20  ;;  %vm351_vm1 = vcmask 1043456   ;;  %vm1243_vm2 = vcmask 261120   ;;  %vm1245_vm3 = vcmask 392192  }
  0x53   : > { %s2476_s11 = sshll.u32 %s336_s12, 3  ;;  %s2837_s9 = smov 48   ;;  %v483_v13 = vunpack.c.0.s8 %v482_v9  ;;  %vm1247_vm4 = vcmask 523264   ;;  %vm1249_vm5 = vcmask 654336   ;;  %vm1253_vm6 = vcmask 916480  }
  0x54   : > { %s3044_s30 = scalar_lea.vmem %s3867_s0, %s2476_s11  ;;  %s2838_s12 = smov 16   ;;  %v500_v36 = vunpack.c.0.s8 %v499_v21  ;;  %vm1251_vm7 = vcmask 785408   ;;  %vm2070_vm8 = vcmask 31744  }
  0x55   : > { %v346_v1 = vld [vmem:[%s3044_s30] sm:$0xff]  ;;  %v3081_v26 = vsub.s32 %v483_v13, %v3078_v14  ;;  %s327_s11 = scalar_lea.vmem [#allocation7], %s3026_s29  ;;  %s334_s16 = scalar_lea.vmem [#allocation8], %s3026_s29 }
  0x56   : > { %453 = vrot.lane.b32.xlu1 %v346_v1, %s2832_s17  ;;  %445 = vrot.lane.b32.xlu0 %v346_v1, %s2833_s22  ;;  %v443_v15 = vrot.slane %v346_v1, 4  ;;  %v3114_v58 = vsub.s32 %v500_v36, %v3078_v14  ;;  %s2271_s15 = sshll.u32 %s327_s11, 4  ;;  %s2252_s29 = scalar_lea.sflag [#allocation4], %s3023_s18  ;;  %s3796_s15 = int_to_ptr.vmem [resolvable:$true] %s2271_s15 }
  0x57   : > { %3895 = vst [vmem:[#allocation14_spill] sm:$0xff] %v3081_v26  ;;  %p3951_p13 = scmp.ne.s32.totalorder %s3890_s21, 0 }
  0x58   : > { %3896 = vst [vmem:[#allocation15_spill] sm:$0xff] %v3114_v58 }
  0x5a   : > { %457 = vrot.lane.b32.xlu1 %v346_v1, %s2834_s14  ;;  %449 = vrot.lane.b32.xlu0 %v346_v1, %s2835_s19 }
  0x5e   : > { %465 = vrot.lane.b32.xlu1 %v346_v1, %s2836_s23  ;;  %461 = vrot.lane.b32.xlu0 %v346_v1, %s2837_s9 }
  0x62   : > { %1270 = vrot.lane.b32.xlu1 %v3055_v2, %s2833_s22  ;;  %469 = vrot.lane.b32.xlu0 %v346_v1, %s2838_s12 }
  0x66   : > { %1278 = vrot.lane.b32.xlu1 %v3055_v2, %s2832_s17  ;;  %1274 = vrot.lane.b32.xlu0 %v3055_v2, %s2835_s19 }
  0x6a   : > { %1286 = vrot.lane.b32.xlu1 %v3055_v2, %s2837_s9  ;;  %1282 = vrot.lane.b32.xlu0 %v3055_v2, %s2834_s14 }
  0x6e   : > { %1294 = vrot.lane.b32.xlu1 %v3055_v2, %s2838_s12  ;;  %1290 = vrot.lane.b32.xlu0 %v3055_v2, %s2836_s23 }
  0x72   : > { %708 = vperm.xlu1 %2561, %v3075_v3  }
  0x76   : > { %2563 = vset.pattern.permute.xlu1 %v2839_v4 }
  0xc8   : > { %v454_v6 = vpop.permute.xlu1 %453  ;;  %v446_v7 = vpop.permute.xlu0 %445 }
  0xc9   : > { %v455_v22 = vrot.slane %v454_v6, 4  ;;  %v447_v23 = vrot.slane %v446_v7, 4  ;;  %v488_v27 = vcombine.low %v446_v7, %v454_v6 }
  0xcb   : > { %v556_v37 = vcombine.low %v447_v23, %v455_v22  ;;  %v3090_v41 = vrot.slane %v488_v27, %v3081_v26 }
  0xcc   : > { %v458_v11 = vpop.permute.xlu1 %457  ;;  %v450_v12 = vpop.permute.xlu0 %449 }
  0xcd   : > { %v451_v16 = vrot.slane %v450_v12, 4  ;;  %v459_v24 = vrot.slane %v458_v11, 4  ;;  %v480_v25 = vcombine.low %v346_v1, %v450_v12  ;;  %v3109_v55 = vrot.slane %v556_v37, %v3081_v26 }
  0xcf   : > { %v548_v28 = vcombine.low %v443_v15, %v451_v16  ;;  %v3084_v38 = vrot.slane %v480_v25, %v3081_v26 }
  0xd0   : > { %v466_v17 = vpop.permute.xlu1 %465  ;;  %v462_v18 = vpop.permute.xlu0 %461 }
  0xd1   : > { %v467_v19 = vrot.slane %v466_v17, 4  ;;  %v514_v29 = vcombine.low %v458_v11, %v466_v17  ;;  %v463_v33 = vrot.slane %v462_v18, 4  ;;  %v3093_v42 = vrot.slane %v548_v28, %v3081_v26 }
  0xd2   : > { %v496_v56 = vcombine.low %v3084_v38, %v3090_v41 }
  0xd3   : > { %v582_v32 = vcombine.low %v459_v24, %v467_v19  ;;  %v3096_v43 = vrot.slane %v514_v29, %v3081_v26  ;;  %v564_v4 = vcombine.low %v3093_v42, %v3109_v55 }
  0xd4   : > { %v1271_v30 = vpop.permute.xlu1 %1270  ;;  %v470_v31 = vpop.permute.xlu0 %469  ;;  %v3127_v7 = vrot.slane %v496_v56, %v3114_v58 }
  0xd5   : > { %v471_v34 = vrot.slane %v470_v31, 4  ;;  %v522_v35 = vcombine.low %v462_v18, %v470_v31  ;;  %v3100_v47 = vrot.slane %v582_v32, %v3081_v26  ;;  %v1272_v48 = vrot.slane %v1271_v30, 4 }
  0xd6   : > { %v3138_v21 = vrot.slane %v564_v4, %v3114_v58 }
  0xd7   : > { %v3087_v39 = vrot.slane %v522_v35, %v3081_v26  ;;  %v590_v40 = vcombine.low %v463_v33, %v471_v34 }
  0xd8   : > { %v1279_v44 = vpop.permute.xlu1 %1278  ;;  %v1275_v46 = vpop.permute.xlu0 %1274 }
  0xd9   : > { %v3103_v49 = vrot.slane %v590_v40, %v3081_v26  ;;  %v1280_v50 = vrot.slane %v1279_v44, 4  ;;  %v530_v51 = vcombine.low %v3096_v43, %v3087_v39  ;;  %v1313_v52 = vcombine.low %v1271_v30, %v1279_v44 }
  0xda   : > { %v1276_v53 = vrot.slane %v1275_v46, 4  ;;  %v1305_v54 = vcombine.low %v3055_v2, %v1275_v46 }
  0xdb   : > { %v1381_v57 = vcombine.low %v1272_v48, %v1280_v50  ;;  %v1320_v59 = vrot.slane %v1313_v52, %v3081_v26  ;;  %v598_v1 = vcombine.low %v3100_v47, %v3103_v49  ;;  %v3121_v2 = vrot.slane %v530_v51, %v3114_v58 }
  0xdc   : > { %v1312_v60 = vrot.slane %v1305_v54, %v3081_v26  ;;  %v1373_v61 = vcombine.low %v1268_v45, %v1276_v53  ;;  %v1287_v62 = vpop.permute.xlu1 %1286  ;;  %v1283_v63 = vpop.permute.xlu0 %1282 }
  0xdd   : > { %v1388_v5 = vrot.slane %v1381_v57, %v3081_v26  ;;  %v1288_v6 = vrot.slane %v1287_v62, 4  ;;  %v1284_v10 = vrot.slane %v1283_v63, 4  ;;  %v3131_v13 = vrot.slane %v598_v1, %v3114_v58 }
  0xde   : > { %v1321_v8 = vcombine.low %v1312_v60, %v1320_v59  ;;  %v1380_v9 = vrot.slane %v1373_v61, %v3081_v26  ;;  %v1322_v19 = vcombine.high %v1312_v60, %v1320_v59  ;;  %v3135_v20 = vcombine.high %v3127_v7, %v3121_v2 }
  0xdf   : > { %v3145_v29 = vcombine.high %v3138_v21, %v3131_v13 }
  0xe0   : > { %v1295_v11 = vpop.permute.xlu1 %1294  ;;  %v1291_v12 = vpop.permute.xlu0 %1290  ;;  %v1329_v27 = vrot.slane %v1321_v8, %v3114_v58  ;;  %v1389_v28 = vcombine.low %v1380_v9, %v1388_v5  ;;  %v1336_v34 = vrot.slane %v1322_v19, %v3114_v58  ;;  %v1390_v35 = vcombine.high %v1380_v9, %v1388_v5 }
  0xe1   : > { %v1296_v15 = vrot.slane %v1295_v11, 4  ;;  %v1347_v16 = vcombine.low %v1287_v62, %v1295_v11  ;;  %v1292_v17 = vrot.slane %v1291_v12, 4  ;;  %v1339_v18 = vcombine.low %v1283_v63, %v1291_v12 }
  0xe2   : > { %v3152_v36 = vsel %vm648_vm0, %v3135_v20, 0.0  ;;  %v3156_v37 = vsel %vm648_vm0, %v3145_v29, 0.0  ;;  %v1397_v48 = vrot.slane %v1389_v28, %v3114_v58  ;;  %v1404_v56 = vrot.slane %v1390_v35, %v3114_v58 }
  0xe3   : > { %v1354_v22 = vrot.slane %v1347_v16, %v3081_v26  ;;  %v1415_v23 = vcombine.low %v1288_v6, %v1296_v15  ;;  %v1346_v24 = vrot.slane %v1339_v18, %v3081_v26  ;;  %v1407_v25 = vcombine.low %v1284_v10, %v1292_v17 }
  0xe4   : > { %v3163_v50 = vadd.f32 %v3156_v37, %v3152_v36 }
  0xe5   : > { %v1422_v30 = vrot.slane %v1415_v23, %v3081_v26  ;;  %v1355_v31 = vcombine.low %v1346_v24, %v1354_v22  ;;  %v1356_v32 = vcombine.high %v1346_v24, %v1354_v22  ;;  %v1414_v33 = vrot.slane %v1407_v25, %v3081_v26 }
  0xe6   : > { %v599_v23 = vcombine.high %v3100_v47, %v3103_v49 }
  0xe7   : > { %v1363_v40 = vrot.slane %v1355_v31, %v3114_v58  ;;  %v1423_v44 = vcombine.low %v1414_v33, %v1422_v30  ;;  %v1370_v45 = vrot.slane %v1356_v32, %v3114_v58  ;;  %v1424_v46 = vcombine.high %v1414_v33, %v1422_v30 }
  0xe8   : > { %v565_v30 = vcombine.high %v3093_v42, %v3109_v55  ;;  %v497_v32 = vcombine.high %v3084_v38, %v3090_v41  ;;  %v613_v49 = vrot.slane %v599_v23, %v3114_v58 }
  0xe9   : > { %v1457_v51 = vcombine.low %v1329_v27, %v1363_v40  ;;  %v1431_v52 = vrot.slane %v1423_v44, %v3114_v58  ;;  %v2445_v53 = vcombine.high %v1329_v27, %v1363_v40  ;;  %v1461_v54 = vcombine.low %v1336_v34, %v1370_v45 }
  0xea   : > { %v1438_v57 = vrot.slane %v1424_v46, %v3114_v58  ;;  %v2447_v59 = vcombine.high %v1336_v34, %v1370_v45  ;;  %v531_v27 = vcombine.high %v3096_v43, %v3087_v39  ;;  %v579_v42 = vrot.slane %v565_v30, %v3114_v58 }
  0xeb   : > { %v1473_v60 = vsel %vm648_vm0, %v1457_v51, 0.0  ;;  %v1458_v61 = vcombine.low %v1397_v48, %v1431_v52  ;;  %v1479_v62 = vsel %vm648_vm0, %v2445_v53, 0.0  ;;  %v2446_v63 = vcombine.high %v1397_v48, %v1431_v52 }
  0xec   : > { %1474 = vadd.xlane.f32.xlu1 %v1473_v60  ;;  %v1485_v1 = vsel %vm648_vm0, %v1461_v54, 0.0  ;;  %v1462_v4 = vcombine.low %v1404_v56, %v1438_v57  ;;  %v1491_v5 = vsel %vm648_vm0, %v2447_v59, 0.0  ;;  %v2448_v6 = vcombine.high %v1404_v56, %v1438_v57 }
  0xed   : > { %v1476_v8 = vsel %vm648_vm0, %v1458_v61, 0.0  ;;  %v1482_v9 = vsel %vm648_vm0, %v2446_v63, 0.0  ;;  %v1505_v10 = vsel %vm648_vm0, %v1457_v51, -inf  ;;  %v1508_v11 = vsel %vm648_vm0, %v1458_v61, -inf }
  0xee   : > { %1477 = vadd.xlane.f32.xlu0 %v1476_v8  ;;  %v3176_v12 = vadd.f32 %v1476_v8, %v1473_v60  ;;  %v3178_v15 = vadd.f32 %v1482_v9, %v1479_v62  ;;  %v1488_v16 = vsel %vm648_vm0, %v1462_v4, 0.0  ;;  %v1494_v17 = vsel %vm648_vm0, %v2448_v6, 0.0 }
  0xef   : > { %v3182_v18 = vadd.f32 %v1488_v16, %v1485_v1  ;;  %v3184_v19 = vadd.f32 %v1494_v17, %v1491_v5  ;;  %v3186_v22 = vmax.f32 %v1505_v10, %v1508_v11  ;;  %v1511_v24 = vsel %vm648_vm0, %v2445_v53, -inf }
  0xf0   : > { %1480 = vadd.xlane.f32.xlu1 %v1479_v62  ;;  %v1514_v25 = vsel %vm648_vm0, %v2446_v63, -inf  ;;  %v1520_v31 = vsel %vm648_vm0, %v1462_v4, -inf  ;;  %v1517_v47 = vsel %vm648_vm0, %v1461_v54, -inf  ;;  %v1526_v39 = vsel %vm648_vm0, %v2448_v6, -inf }
  0xf1   : > { %v3194_v28 = vmax.f32 %v1511_v24, %v1514_v25  ;;  %v3203_v33 = vmax.f32 %v1517_v47, %v1520_v31  ;;  %v1523_v43 = vsel %vm648_vm0, %v2447_v59, -inf  ;;  %v545_v34 = vrot.slane %v531_v27, %v3114_v58  ;;  %v3255_v8 = vpop.permute.xlu1 %708 }
  0xf2   : > { %1483 = vadd.xlane.f32.xlu0 %v1482_v9  ;;  %v3209_v55 = vmax.f32 %v1523_v43, %v1526_v39  ;;  %v511_v38 = vrot.slane %v497_v32, %v3114_v58  ;;  %v637_v41 = vcombine.low %v579_v42, %v613_v49  ;;  %v2432_v44 = vcombine.high %v579_v42, %v613_v49 }
  0xf3   : > { %v632_v45 = vcombine.low %v3127_v7, %v3121_v2  ;;  %v633_v48 = vcombine.low %v3138_v21, %v3131_v13  ;;  %v688_v59 = vsel %vm648_vm0, %v3135_v20, -inf  ;;  %v691_v61 = vsel %vm648_vm0, %v3145_v29, -inf }
  0xf4   : > { %1486 = vadd.xlane.f32.xlu1 %v1485_v1  ;;  %v636_v35 = vcombine.low %v511_v38, %v545_v34  ;;  %v2431_v40 = vcombine.high %v511_v38, %v545_v34  ;;  %v664_v46 = vsel %vm648_vm0, %v637_v41, 0.0  ;;  %v670_v54 = vsel %vm648_vm0, %v2432_v44, 0.0 }
  0xf5   : > { %v682_v56 = vsel %vm648_vm0, %v632_v45, -inf  ;;  %v685_v2 = vsel %vm648_vm0, %v633_v48, -inf  ;;  %v652_v7 = vsel %vm648_vm0, %v633_v48, 0.0  ;;  %v649_v13 = vsel %vm648_vm0, %v632_v45, 0.0 }
  0xf6   : > { %1489 = vadd.xlane.f32.xlu0 %v1488_v16  ;;  %v661_v51 = vsel %vm648_vm0, %v636_v35, 0.0  ;;  %v667_v52 = vsel %vm648_vm0, %v2431_v40, 0.0  ;;  %v3228_v21 = vmax.f32 %v682_v56, %v685_v2  ;;  %v3232_v60 = vadd.f32 %v652_v7, %v649_v13 }
  0xf7   : > { %v3219_v53 = vadd.f32 %v664_v46, %v661_v51  ;;  %v3223_v57 = vadd.f32 %v670_v54, %v667_v52  ;;  %v3236_v62 = vmax.f32 %v688_v59, %v691_v61  ;;  %v694_v63 = vsel %vm648_vm0, %v636_v35, -inf }
  0xf8   : > { %1492 = vadd.xlane.f32.xlu1 %v1491_v5  ;;  %v697_v1 = vsel %vm648_vm0, %v637_v41, -inf  ;;  %v703_v5 = vsel %vm648_vm0, %v2432_v44, -inf  ;;  %v700_v20 = vsel %vm648_vm0, %v2431_v40, -inf  ;;  %v2843_v29 = vmov 3  }
  0xf9   : > { %v3240_v4 = vmax.f32 %v694_v63, %v697_v1  ;;  %v3244_v6 = vmax.f32 %v700_v20, %v703_v5  ;;  %v1677_v34 = vrot.slane %v3178_v15, 4  ;;  %v1684_v42 = vrot.slane %v3182_v18, 4 }
  0xfa   : > { %1495 = vadd.xlane.f32.xlu0 %v1494_v17  ;;  %v1691_v41 = vrot.slane %v3184_v19, 4  ;;  %v1702_v40 = vrot.slane %v3186_v22, 4 }
  0xfb   : > { %v1678_v45 = vadd.f32 %v1677_v34, %v3178_v15  ;;  %v878_v15 = vrot.slane %v3223_v57, 4 }
  0xfc   : > { %1506 = vmax.xlane.f32.xlu1 %v1505_v10 }
  0xfe   : > { %1509 = vmax.xlane.f32.xlu0 %v1508_v11 }
 0x100   : > { %1512 = vmax.xlane.f32.xlu1 %v1511_v24 }
 0x102   : > { %1515 = vmax.xlane.f32.xlu0 %v1514_v25 }
 0x104   : > { %1518 = vmax.xlane.f32.xlu1 %v1517_v47 }
 0x106   : > { %1521 = vmax.xlane.f32.xlu0 %v1520_v31 }
 0x108   : > { %1524 = vmax.xlane.f32.xlu1 %v1523_v43  ;;  %v1670_v43 = vrot.slane %v3176_v12, 4 }
 0x10a   : > { %1527 = vmax.xlane.f32.xlu0 %v1526_v39  ;;  %v1671_v44 = vadd.f32 %v1670_v43, %v3176_v12  ;;  %v1703_v12 = vmax.f32 %v3186_v22, %v1702_v40 }
 0x10c   : > { %662 = vadd.xlane.f32.xlu1 %v661_v51  ;;  %v1692_v51 = vadd.f32 %v1691_v41, %v3184_v19  ;;  %v1704_v34 = vrot.slane %v1703_v12, 2  ;;  %v896_v41 = vrot.slane %v3236_v62, 4 }
 0x10e   : > { %650 = vadd.xlane.f32.xlu0 %v649_v13  ;;  %v1672_v13 = vrot.slane %v1671_v44, 2 }
 0x110   : > { %668 = vadd.xlane.f32.xlu1 %v667_v52  ;;  %v1709_v52 = vrot.slane %v3194_v28, 4  ;;  %v1673_v40 = vadd.f32 %v1672_v13, %v1671_v44  ;;  %v1705_v44 = vmax.f32 %v1703_v12, %v1704_v34 }
 0x112   : > { %656 = vadd.xlane.f32.xlu0 %v3152_v36  ;;  %v2844_v36 = vmov 4   ;;  %v1674_v13 = vrot.slane %v1673_v40, 1 }
 0x114   : > { %683 = vmax.xlane.f32.xlu1 %v682_v56  ;;  %v1716_v56 = vrot.slane %v3203_v33, 4 }
 0x116   : > { %659 = vadd.xlane.f32.xlu0 %v3156_v37  ;;  %v2845_v37 = vmov 5  }
 0x118   : > { %689 = vmax.xlane.f32.xlu1 %v688_v59  ;;  %v1679_v59 = vrot.slane %v1678_v45, 2 }
 0x11a   : > { %665 = vadd.xlane.f32.xlu0 %v664_v46  ;;  %v1685_v46 = vadd.f32 %v1684_v42, %v3182_v18  ;;  %v857_v18 = vrot.slane %v3232_v60, 4  ;;  %v879_v42 = vadd.f32 %v878_v15, %v3223_v57 }
 0x11c   : > { %695 = vmax.xlane.f32.xlu1 %v694_v63  ;;  %v1693_v63 = vrot.slane %v1692_v51, 2 }
 0x11e   : > { %671 = vadd.xlane.f32.xlu0 %v670_v54  ;;  %v864_v54 = vrot.slane %v3163_v50, 4 }
 0x120   : > { %701 = vmax.xlane.f32.xlu1 %v700_v20  ;;  %v865_v20 = vadd.f32 %v864_v54, %v3163_v50  ;;  %v1680_v50 = vadd.f32 %v1679_v59, %v1678_v45  ;;  %v1694_v54 = vadd.f32 %v1693_v63, %v1692_v51  ;;  %v880_v45 = vrot.slane %v879_v42, 2 }
 0x122   : > { %686 = vmax.xlane.f32.xlu0 %v685_v2  ;;  %v871_v2 = vrot.slane %v3219_v53, 4  ;;  %v866_v58 = vrot.slane %v865_v20, 2  ;;  %v1681_v59 = vrot.slane %v1680_v50, 1  ;;  %v1695_v63 = vrot.slane %v1694_v54, 1 }
 0x124   : > { %653 = vadd.xlane.f32.xlu1 %v652_v7  ;;  %v872_v22 = vadd.f32 %v871_v2, %v3219_v53 }
 0x126   : > { %692 = vmax.xlane.f32.xlu0 %v691_v61  ;;  %v1686_v61 = vrot.slane %v1685_v46, 2 }
 0x12a   : > { %698 = vmax.xlane.f32.xlu0 %v697_v1  ;;  %v1710_v1 = vmax.f32 %v3194_v28, %v1709_v52  ;;  %v858_v28 = vadd.f32 %v857_v18, %v3232_v60  ;;  %v1687_v52 = vadd.f32 %v1686_v61, %v1685_v46  ;;  %v910_v60 = vrot.slane %v3244_v6, 4 }
 0x12b   : > { %v897_v18 = vmax.f32 %v3236_v62, %v896_v41  ;;  %v881_v62 = vadd.f32 %v880_v45, %v879_v42 }
 0x12c   : > { %v859_v46 = vrot.slane %v858_v28, 2  ;;  %v1688_v51 = vrot.slane %v1687_v52, 1  ;;  %v911_v12 = vmax.f32 %v3244_v6, %v910_v60 }
 0x12d   : > { %v882_v42 = vrot.slane %v881_v62, 1 }
 0x12e   : > { %704 = vmax.xlane.f32.xlu0 %v703_v5  ;;  %v1723_v5 = vrot.slane %v3209_v55, 4  ;;  %v860_v41 = vadd.f32 %v859_v46, %v858_v28  ;;  %v912_v6 = vrot.slane %v911_v12, 2 }
 0x130   : > { %v1724_v2 = vmax.f32 %v3209_v55, %v1723_v5  ;;  %v861_v28 = vrot.slane %v860_v41, 1 }
 0x135   : > { %778 = vperm.xlu1 %2563, %v3075_v3  }
 0x139   : > { %2564 = vset.pattern.permute.xlu1 %v2843_v29  ;;  %v1717_v29 = vmax.f32 %v3203_v33, %v1716_v56  ;;  %v903_v33 = vrot.slane %v3240_v4, 4  ;;  %v1711_v56 = vrot.slane %v1710_v1, 2 }
 0x13a   : > { %917 = vperm.xlu1 %2564, %v3075_v3  }
 0x13b   : > { %v1718_v26 = vrot.slane %v1717_v29, 2  ;;  %v904_v61 = vmax.f32 %v3240_v4, %v903_v33  ;;  %v1712_v5 = vmax.f32 %v1710_v1, %v1711_v56  ;;  %v1689_v4 = vadd.f32 %v1688_v51, %v1687_v52 }
 0x13c   : > { %v1696_v1 = vadd.f32 %v1695_v63, %v1694_v54  ;;  %v3369_v51 = vsub.s32 5, %v3078_v14  ;;  %v3372_v63 = vsub.s32 6, %v3078_v14 }
 0x13d   : > { %v905_v33 = vrot.slane %v904_v61, 2  ;;  %v1713_v56 = vrot.slane %v1712_v5, 1  ;;  %v3356_v45 = vmul.f32 0.0625, %v1689_v4 }
 0x13e   : > { %2565 = vset.pattern.permute.xlu1 %v2844_v36  ;;  %v889_v36 = vrot.slane %v3228_v21, 4 }
 0x13f   : > { %931 = vperm.xlu1 %2565, %v3075_v3   ;;  %v906_v54 = vmax.f32 %v904_v61, %v905_v33 }
 0x140   : > { %v890_v57 = vmax.f32 %v3228_v21, %v889_v36  ;;  %v867_v21 = vadd.f32 %v866_v58, %v865_v20  ;;  %v1719_v36 = vmax.f32 %v1717_v29, %v1718_v26 }
 0x141   : > { %v907_v61 = vrot.slane %v906_v54, 1 }
 0x142   : > { %v868_v26 = vrot.slane %v867_v21, 1 }
 0x143   : > { %2566 = vset.pattern.permute.xlu1 %v2845_v37  ;;  %v3324_v37 = vsub.s32 4, %v3078_v14 }
 0x144   : > { %739 = vperm.xlu0 %2562, %v3075_v3   ;;  %949 = vperm.xlu1 %2566, %v3075_v3  }
 0x148   : > { %2568 = vset.pattern.permute.xlu0 %v2831_v0  ;;  %2567 = vset.pattern.permute.xlu1 %v2831_v0 }
 0x179   : > { %v3257_v9 = vpop.xlane.xlu1 %1474 }
 0x17b   : > { %v3259_v10 = vpop.xlane.xlu0 %1477 }
 0x17d   : > { %v3261_v11 = vpop.xlane.xlu1 %1480 }
 0x17f   : > { %v3263_v16 = vpop.xlane.xlu0 %1483 }
 0x181   : > { %v3265_v17 = vpop.xlane.xlu1 %1486 }
 0x183   : > { %v3267_v23 = vpop.xlane.xlu0 %1489 }
 0x185   : > { %v3269_v24 = vpop.xlane.xlu1 %1492 }
 0x187   : > { %v3271_v3 = vpop.xlane.xlu0 %1495 }
 0x189   : > { %v3273_v25 = vpop.xlane.xlu1 %1506 }
 0x18b   : > { %v3275_v0 = vpop.xlane.xlu0 %1509 }
 0x18d   : > { %v3277_v27 = vpop.xlane.xlu1 %1512 }
 0x18e   : > { %3897 = vst [vmem:[#allocation16_spill] sm:$0xff] %v3277_v27  ;;  %v1504_v27 = vmul.f32 0.0625, %v3271_v3 }
 0x18f   : > { %v3279_v30 = vpop.xlane.xlu0 %1515 }
 0x190   : > { %3898 = vst [vmem:[#allocation17_spill] sm:$0xff] %v3279_v30  ;;  %v1503_v30 = vmul.f32 0.0625, %v3269_v24 }
 0x191   : > { %v3281_v31 = vpop.xlane.xlu1 %1518 }
 0x192   : > { %3899 = vst [vmem:[#allocation18_spill] sm:$0xff] %v3281_v31 }
 0x193   : > { %v3283_v32 = vpop.xlane.xlu0 %1521 }
 0x194   : > { %3900 = vst [vmem:[#allocation19_spill] sm:$0xff] %v3283_v32  ;;  %v1682_v32 = vadd.f32 %v1681_v59, %v1680_v50 }
 0x195   : > { %v3285_v47 = vpop.xlane.xlu1 %1524 }
 0x196   : > { %3901 = vst [vmem:[#allocation20_spill] sm:$0xff] %v3285_v47  ;;  %v898_v47 = vrot.slane %v897_v18, 2  ;;  %v3354_v52 = vmul.f32 0.0625, %v1682_v32  ;;  %v883_v32 = vadd.f32 %v882_v42, %v881_v62  ;;  %v3385_v62 = vsub.s32 0, %v3078_v14 }
 0x197   : > { %v3287_v49 = vpop.xlane.xlu0 %1527  ;;  %v1540_v42 = vrot.slane %v3255_v8, %v3372_v63 }
 0x198   : > { %3902 = vst [vmem:[#allocation21_spill] sm:$0xff] %v3287_v49  ;;  %3917 = vst [vmem:[#allocation36_spill] sm:$0xff] %v3385_v62 }
 0x199   : > { %v3289_v39 = vpop.xlane.xlu1 %662 }
 0x19b   : > { %v3294_v38 = vpop.xlane.xlu0 %650 }
 0x19d   : > { %v3297_v35 = vpop.xlane.xlu1 %668 }
 0x19f   : > { %v3303_v48 = vpop.xlane.xlu0 %656 }
 0x1a1   : > { %v3310_v7 = vpop.xlane.xlu1 %683 }
 0x1a2   : > { %3903 = vst [vmem:[#allocation22_spill] sm:$0xff] %v3310_v7  ;;  %v1675_v7 = vadd.f32 %v1674_v13, %v1673_v40  ;;  %v899_v40 = vmax.f32 %v897_v18, %v898_v47  ;;  %v913_v13 = vmax.f32 %v911_v12, %v912_v6  ;;  %v1532_v12 = vrot.slane %v3255_v8, %v3324_v37 }
 0x1a3   : > { %v3315_v19 = vpop.xlane.xlu0 %659  ;;  %v908_v6 = vmax.f32 %v906_v54, %v907_v61  ;;  %v1498_v61 = vmul.f32 0.0625, %v3259_v10 }
 0x1a4   : > { %3904 = vst [vmem:[#allocation23_spill] sm:$0xff] %v3315_v19  ;;  %v873_v19 = vrot.slane %v872_v22, 2  ;;  %v3352_v50 = vmul.f32 0.0625, %v1675_v7  ;;  %v862_v7 = vadd.f32 %v861_v28, %v860_v41  ;;  %v900_v18 = vrot.slane %v899_v40, 1 }
 0x1a5   : > { %v3326_v43 = vpop.xlane.xlu1 %689  ;;  %v914_v33 = vrot.slane %v913_v13, 1 }
 0x1a6   : > { %3905 = vst [vmem:[#allocation24_spill] sm:$0xff] %v3326_v43  ;;  %v874_v49 = vadd.f32 %v873_v19, %v872_v22  ;;  %v891_v43 = vrot.slane %v890_v57, 2  ;;  %v1720_v19 = vrot.slane %v1719_v36, 1 }
 0x1a7   : > { %v3332_v53 = vpop.xlane.xlu0 %665 }
 0x1a8   : > { %3906 = vst [vmem:[#allocation25_spill] sm:$0xff] %v3332_v53  ;;  %v1725_v53 = vrot.slane %v1724_v2, 2  ;;  %v875_v20 = vrot.slane %v874_v49, 1  ;;  %v892_v29 = vmax.f32 %v890_v57, %v891_v43  ;;  %v869_v57 = vadd.f32 %v868_v26, %v867_v21 }
 0x1a9   : > { %v3337_v15 = vpop.xlane.xlu1 %695  ;;  %v3362_v46 = vmax.f32 %v1719_v36, %v1720_v19  ;;  %v887_v26 = vmul.f32 0.0625, %v883_v32  ;;  %v884_v19 = vmul.f32 0.0625, %v862_v7  ;;  %v1497_v32 = vmul.f32 0.0625, %v3257_v9 }
 0x1aa   : > { %3907 = vst [vmem:[#allocation26_spill] sm:$0xff] %v3337_v15  ;;  %v1706_v15 = vrot.slane %v1705_v44, 1  ;;  %v1726_v58 = vmax.f32 %v1724_v2, %v1725_v53  ;;  %v3358_v53 = vmul.f32 0.0625, %v1696_v1  ;;  %v3360_v2 = vmax.f32 %v1712_v5, %v1713_v56 }
 0x1ab   : > { %v3341_v55 = vpop.xlane.xlu0 %671  ;;  %3914 = vst [vmem:[#allocation33_spill] sm:$0xff] %v3362_v46  ;;  %v3375_v5 = vsub.s32 7, %v3078_v14  ;;  %v885_v36 = vmul.f32 0.0625, %v869_v57  ;;  %v3388_v1 = vsub.s32 3, %v3078_v14  ;;  %v3406_v57 = vrot.slane %v3255_v8, %v3385_v62 }
 0x1ac   : > { %v3350_v60 = vmax.f32 %v1705_v44, %v1706_v15  ;;  %3912 = vst [vmem:[#allocation31_spill] sm:$0xff] %v3358_v53  ;;  %3913 = vst [vmem:[#allocation32_spill] sm:$0xff] %v3360_v2  ;;  %v1727_v43 = vrot.slane %v1726_v58, 1  ;;  %v876_v15 = vadd.f32 %v875_v20, %v874_v49  ;;  %v893_v44 = vrot.slane %v892_v29, 1 }
 0x1ad   : > { %v3344_v34 = vpop.xlane.xlu1 %701  ;;  %v3378_v49 = vsub.s32 2, %v3078_v14  ;;  %v901_v20 = vmax.f32 %v899_v40, %v900_v18  ;;  %v1544_v28 = vrot.slane %v3255_v8, %v3375_v5  ;;  %v725_v7 = vrot.slane %v3255_v8, %v3388_v1 }
 0x1ae   : > { %3908 = vst [vmem:[#allocation27_spill] sm:$0xff] %v3344_v34  ;;  %3911 = vst [vmem:[#allocation30_spill] sm:$0xff] %v3350_v60  ;;  %v3380_v21 = vmax.f32 %v1726_v58, %v1727_v43  ;;  %v886_v41 = vmul.f32 0.0625, %v876_v15  ;;  %v894_v4 = vmax.f32 %v892_v29, %v893_v44  ;;  %v1536_v58 = vrot.slane %v3255_v8, %v3369_v51 }
 0x1af   : > { %v3346_v31 = vpop.xlane.xlu0 %686  ;;  %v3400_v29 = vrot.slane %v3255_v8, %v3378_v49  ;;  %v915_v44 = vmax.f32 %v913_v13, %v914_v33  ;;  %v3415_v18 = vsub.s32 1, %v3078_v14  ;;  %v1500_v53 = vmul.f32 0.0625, %v3263_v16 }
 0x1b0   : > { %3909 = vst [vmem:[#allocation28_spill] sm:$0xff] %v3346_v31  ;;  %3916 = vst [vmem:[#allocation35_spill] sm:$0xff] %v3380_v21  ;;  %v1501_v14 = vmul.f32 0.0625, %v3265_v17  ;;  %v1502_v60 = vmul.f32 0.0625, %v3267_v23  ;;  %v674_v17 = vmul.f32 0.0625, %v3294_v38  ;;  %v676_v23 = vmul.f32 0.0625, %v3303_v48 }
 0x1b1   : > { %v3348_v22 = vpop.xlane.xlu1 %653  ;;  %v681_v24 = vmul.f32 0.0625, %v3341_v55  ;;  %v1549_v3 = vmul.f32 %v1532_v12, %v1497_v32  ;;  %v1552_v38 = vmul.f32 %v1536_v58, %v1500_v53 }
 0x1b2   : > { %3910 = vst [vmem:[#allocation29_spill] sm:$0xff] %v3348_v22 }
 0x1b3   : > { %v3364_v59 = vpop.xlane.xlu0 %692 }
 0x1b4   : > { %3915 = vst [vmem:[#allocation34_spill] sm:$0xff] %v3364_v59 }
 0x1b5   : > { %v3366_v47 = vpop.permute.xlu1 %778 }
 0x1b6   : > { %v1604_v32 = vrot.slane %v3366_v47, %v3372_v63 }
 0x1b7   : > { %v3402_v43 = vpop.xlane.xlu0 %698 }
 0x1b8   : > { %3918 = vst [vmem:[#allocation37_spill] sm:$0xff] %v3402_v43  ;;  %v1499_v43 = vmul.f32 0.0625, %v3261_v11 }
 0x1b9   : > { %v3390_v56 = vpop.permute.xlu1 %917 }
 0x1ba   : > { %v919_v40 = vrot.slane %v3390_v56, 1  ;;  %v920_v54 = vrot.slane %v3390_v56, 2  ;;  %v921_v15 = vrot.slane %v3390_v56, 3  ;;  %v926_v59 = vmul.f32 %v3390_v56, %v884_v19 }
 0x1bb   : > { %v3428_v11 = vpop.xlane.xlu0 %704  ;;  %v1730_v48 = vrot.slane %v3390_v56, 5 }
 0x1bc   : > { %v928_v22 = vmul.f32 %v920_v54, %v886_v41  ;;  %v929_v10 = vmul.f32 %v921_v15, %v887_v26  ;;  %v927_v46 = vmul.f32 %v919_v40, %v885_v36  ;;  %v1554_v40 = vmul.f32 %v1540_v42, %v1502_v60 }
 0x1bd   : > { %v1555_v54 = vmul.f32 %v1544_v28, %v1503_v30  ;;  %v3462_v30 = vrot.slane %v3366_v47, %v3385_v62  ;;  %v3470_v60 = vrot.slane %v3366_v47, %v3378_v49 }
 0x1be   : > { %v3421_v21 = vpop.permute.xlu1 %931 }
 0x1bf   : > { %v933_v13 = vrot.slane %v3421_v21, 1  ;;  %v934_v9 = vrot.slane %v3421_v21, 2  ;;  %v935_v33 = vrot.slane %v3421_v21, 3  ;;  %v940_v31 = vmul.f32 %v3421_v21, %v894_v4 }
 0x1c0   : > { %v678_v4 = vmul.f32 0.0625, %v3289_v39  ;;  %v1550_v39 = vmul.f32 %v1532_v12, %v1498_v61  ;;  %v737_v12 = vmul.f32 %v725_v7, %v681_v24  ;;  %v3925_v24 = vld [vmem:[#allocation18_spill] sm:$0xff] }
 0x1c1   : > { %v942_v16 = vmul.f32 %v934_v9, %v908_v6  ;;  %v3430_v34 = vadd.f32 %v940_v31, %v926_v59  ;;  %v943_v19 = vmul.f32 %v935_v33, %v915_v44  ;;  %v941_v2 = vmul.f32 %v933_v13, %v901_v20 }
 0x1c2   : > { %v680_v31 = vmul.f32 0.0625, %v3297_v35  ;;  %v3446_v59 = vrot.slane %v3255_v8, %v3415_v18  ;;  %v1551_v20 = vmul.f32 %v1536_v58, %v1499_v43  ;;  %v1553_v6 = vmul.f32 %v1540_v42, %v1501_v14 }
 0x1c3   : > { %3919 = vst [vmem:[#allocation38_spill] sm:$0xff] %v3430_v34  ;;  %v3437_v41 = vadd.f32 %v942_v16, %v928_v22  ;;  %v3439_v36 = vadd.f32 %v943_v19, %v929_v10  ;;  %v3441_v26 = vadd.f32 %v941_v2, %v927_v46  ;;  %v740_v22 = vpop.permute.xlu0 %739  ;;  %v3450_v2 = vmul.f32 %v1544_v28, %v1504_v27 }
 0x1c4   : > { %v734_v35 = vmul.f32 %v3400_v29, %v678_v4  ;;  %v730_v46 = vmul.f32 %v3406_v57, %v674_v17  ;;  %v1729_v8 = vrot.slane %v3390_v56, 4  ;;  %v3456_v15 = vmul.f32 %v725_v7, %v680_v31  ;;  %v3923_v4 = vld [vmem:[#allocation16_spill] sm:$0xff]  ;;  %v3924_v31 = vld [vmem:[#allocation17_spill] sm:$0xff] }
 0x1c5   : > { %3920 = vst [vmem:[#allocation39_spill] sm:$0xff] %v3437_v41  ;;  %3921 = vst [vmem:[#allocation40_spill] sm:$0xff] %v3439_v36  ;;  %v732_v55 = vmul.f32 %v3446_v59, %v676_v23  ;;  %v1560_v53 = vrot.slane %v740_v22, %v3324_v37  ;;  %v3466_v27 = vrot.slane %v3366_v47, %v3415_v18  ;;  %v1731_v58 = vrot.slane %v3390_v56, 6  ;;  %v3930_v36 = vld [vmem:[#allocation26_spill] sm:$0xff] }
 0x1c6   : > { %3922 = vst [vmem:[#allocation41_spill] sm:$0xff] %v3441_v26  ;;  %v3475_v42 = vrot.slane %v3366_v47, %v3388_v1  ;;  %v1596_v28 = vrot.slane %v3366_v47, %v3324_v37  ;;  %v1600_v43 = vrot.slane %v3366_v47, %v3369_v51  ;;  %v1564_v44 = vrot.slane %v740_v22, %v3369_v51  ;;  %v3929_v26 = vld [vmem:[#allocation30_spill] sm:$0xff] }
 0x1c7   : > { %v1568_v7 = vrot.slane %v740_v22, %v3372_v63  ;;  %v1737_v61 = vmul.f32 %v1729_v8, %v3352_v50  ;;  %v1738_v13 = vmul.f32 %v1730_v48, %v3354_v52  ;;  %v1741_v9 = vrot.slane %v3421_v21, 4  ;;  %v3926_v8 = vld [vmem:[#allocation19_spill] sm:$0xff] }
 0x1c8   : > { %v744_v33 = vrot.slane %v740_v22, %v3385_v62  ;;  %v1572_v37 = vrot.slane %v740_v22, %v3375_v5  ;;  %v1577_v14 = vmul.f32 %v1560_v53, %v3273_v25  ;;  %v1742_v10 = vrot.slane %v3421_v21, 5 }
 0x1c9   : > { %v3493_v51 = vrot.slane %v740_v22, %v3378_v49  ;;  %v1578_v16 = vmul.f32 %v1560_v53, %v3275_v0  ;;  %v1739_v63 = vmul.f32 %v1731_v58, %v3356_v45  ;;  %v1743_v50 = vrot.slane %v3421_v21, 6  ;;  %v3927_v0 = vld [vmem:[#allocation22_spill] sm:$0xff]  ;;  %v3928_v45 = vld [vmem:[#allocation20_spill] sm:$0xff] }
 0x1ca   : > { %v1744_v52 = vrot.slane %v3421_v21, 7  ;;  %v3500_v19 = vrot.slane %v740_v22, %v3415_v18  ;;  %v1579_v17 = vmul.f32 %v1564_v44, %v3923_v4  ;;  %v756_v25 = vrot.slane %v740_v22, %v3388_v1 }
 0x1cb   : > { %v1580_v23 = vmul.f32 %v1564_v44, %v3924_v31  ;;  %v1581_v49 = vmul.f32 %v1568_v7, %v3925_v24  ;;  %v1582_v48 = vmul.f32 %v1568_v7, %v3926_v8  ;;  %v761_v53 = vmul.f32 %v744_v33, %v3927_v0  ;;  %v3931_v31 = vld [vmem:[#allocation32_spill] sm:$0xff] }
 0x1cc   : > { %v1583_v58 = vmul.f32 %v1572_v37, %v3928_v45  ;;  %v1585_v62 = vadd.f32 %v1577_v14, %v1549_v3  ;;  %v1749_v21 = vmul.f32 %v1741_v9, %v3929_v26  ;;  %v765_v18 = vmul.f32 %v3493_v51, %v3930_v36  ;;  %v3932_v7 = vld [vmem:[#allocation24_spill] sm:$0xff] }
 0x1cd   : > { %v1586_v41 = vadd.f32 %v1578_v16, %v1550_v39  ;;  %v1587_v4 = vadd.f32 %v1579_v17, %v1551_v20  ;;  %v1588_v34 = vadd.f32 %v1580_v23, %v1552_v38  ;;  %v1589_v1 = vadd.f32 %v1581_v49, %v1553_v6  ;;  %v3933_v39 = vld [vmem:[#allocation27_spill] sm:$0xff] }
 0x1ce   : > { %v1590_v22 = vadd.f32 %v1582_v48, %v1554_v40  ;;  %v3512_v44 = vadd.f32 %v1583_v58, %v1555_v54  ;;  %v1750_v24 = vmul.f32 %v1742_v10, %v3931_v31  ;;  %v763_v8 = vmul.f32 %v3500_v19, %v3932_v7  ;;  %v3934_v40 = vld [vmem:[#allocation33_spill] sm:$0xff] }
 0x1cf   : > { %v768_v0 = vmul.f32 %v756_v25, %v3428_v11  ;;  %v1613_v3 = vadd.f32 %v1596_v28, %v1585_v62  ;;  %v1614_v14 = vadd.f32 %v1596_v28, %v1586_v41  ;;  %v769_v26 = vadd.f32 %v761_v53, %v730_v46 }
 0x1d0   : > { %v1615_v9 = vadd.f32 %v1600_v43, %v1587_v4  ;;  %v1616_v45 = vadd.f32 %v1600_v43, %v1588_v34  ;;  %v1617_v36 = vadd.f32 %v1604_v32, %v1589_v1  ;;  %v767_v20 = vmul.f32 %v756_v25, %v3933_v39  ;;  %v3935_v34 = vld [vmem:[#allocation21_spill] sm:$0xff] }
 0x1d1   : > { %v773_v38 = vadd.f32 %v765_v18, %v734_v35  ;;  %v1618_v6 = vadd.f32 %v1604_v32, %v1590_v22  ;;  %v1751_v54 = vmul.f32 %v1743_v50, %v3934_v40  ;;  %v2449_v16 = vmul.f32 -1.442695, %v1613_v3  ;;  %v3936_v50 = vld [vmem:[#allocation29_spill] sm:$0xff]  ;;  %v3938_v18 = vld [vmem:[#allocation23_spill] sm:$0xff] }
 0x1d2   : > { %v2450_v17 = vmul.f32 -1.442695, %v1614_v14  ;;  %v2451_v10 = vmul.f32 -1.442695, %v1615_v9  ;;  %v3520_v23 = vadd.f32 %v1749_v21, %v1737_v61  ;;  %v771_v49 = vadd.f32 %v763_v8, %v732_v55  ;;  %v3943_v9 = vld [vmem:[#allocation37_spill] sm:$0xff] }
 0x1d3   : > { %v776_v48 = vadd.f32 %v768_v0, %v737_v12  ;;  %v2452_v11 = vmul.f32 -1.442695, %v1616_v45  ;;  %v3522_v62 = vadd.f32 %v1750_v24, %v1738_v13  ;;  %v800_v41 = vadd.f32 %v3462_v30, %v769_v26  ;;  %v3937_v13 = vld [vmem:[#allocation28_spill] sm:$0xff]  ;;  %v3941_v24 = vld [vmem:[#allocation31_spill] sm:$0xff] }
 0x1d4   : > { %v1584_v46 = vmul.f32 %v1572_v37, %v3935_v34  ;;  %2573 = vpow2.f32 %v2449_v16  ;;  %v2453_v28 = vmul.f32 -1.442695, %v1617_v36  ;;  %v804_v35 = vadd.f32 %v3470_v60, %v773_v38 }
 0x1d5   : > { %2575 = vpow2.f32 %v2450_v17  ;;  %v2454_v43 = vmul.f32 -1.442695, %v1618_v6  ;;  %v3527_v32 = vadd.f32 %v1751_v54, %v1739_v63  ;;  %v675_v61 = vmul.f32 0.0625, %v3936_v50 }
 0x1d6   : > { %v3532_v55 = vrot.slane %v3366_v47, %v3375_v5  ;;  %v1732_v12 = vrot.slane %v3390_v56, 7  ;;  %2577 = vpow2.f32 %v2451_v10  ;;  %v762_v25 = vmul.f32 %v744_v33, %v3937_v13  ;;  %v3939_v5 = vld [vmem:[#allocation35_spill] sm:$0xff]  ;;  %v3940_v33 = vld [vmem:[#allocation34_spill] sm:$0xff] }
 0x1d7   : > { %v775_v37 = vadd.f32 %v767_v20, %v3456_v15  ;;  %v802_v53 = vadd.f32 %v3466_v27, %v771_v49  ;;  %2579 = vpow2.f32 %v2452_v11  ;;  %v807_v58 = vadd.f32 %v3475_v42, %v776_v48 }
 0x1d8   : > { %v2433_v63 = vmul.f32 -1.442695, %v800_v41  ;;  %v1592_v21 = vadd.f32 %v1584_v46, %v3450_v2  ;;  %2581 = vpow2.f32 %v2453_v28  ;;  %v677_v4 = vmul.f32 0.0625, %v3938_v18 }
 0x1d9   : > { %v2437_v47 = vmul.f32 -1.442695, %v804_v35  ;;  %2583 = vpow2.f32 %v2454_v43  ;;  %v1752_v56 = vmul.f32 %v1744_v52, %v3939_v5  ;;  %v731_v1 = vmul.f32 %v3406_v57, %v675_v61  ;;  %v3942_v57 = vld [vmem:[#allocation25_spill] sm:$0xff] }
 0x1da   : > { %v764_v15 = vmul.f32 %v3500_v19, %v3940_v33  ;;  %v806_v22 = vadd.f32 %v3475_v42, %v775_v37  ;;  %v2435_v31 = vmul.f32 -1.442695, %v802_v53  ;;  %v1740_v7 = vmul.f32 %v1732_v12, %v3941_v24 }
 0x1db   : > { %v770_v8 = vadd.f32 %v762_v25, %v731_v1  ;;  %2585 = vpow2.f32 %v2433_v63  ;;  %v2440_v2 = vmul.f32 -1.442695, %v807_v58  ;;  %v1620_v0 = vadd.f32 %v3532_v55, %v1592_v21 }
 0x1dc   : > { %v733_v3 = vmul.f32 %v3446_v59, %v677_v4  ;;  %2587 = vpow2.f32 %v2437_v47  ;;  %v3549_v14 = vadd.f32 %v1752_v56, %v1740_v7  ;;  %v679_v26 = vmul.f32 0.0625, %v3942_v57 }
 0x1dd   : > { %v766_v19 = vmul.f32 %v3493_v51, %v3943_v9  ;;  %2589 = vpow2.f32 %v2435_v31  ;;  %v2439_v36 = vmul.f32 -1.442695, %v806_v22  ;;  %v801_v38 = vadd.f32 %v3462_v30, %v770_v8 }
 0x1de   : > { %v2574_v52 = vpop.eup %2573  ;;  %v772_v45 = vadd.f32 %v764_v15, %v733_v3  ;;  %2591 = vpow2.f32 %v2440_v2  ;;  %v2456_v6 = vmul.f32 -1.442695, %v1620_v0  ;;  %v735_v17 = vmul.f32 %v3400_v29, %v679_v26 }
 0x1df   : > { %v2576_v42 = vpop.eup %2575  ;;  %v1645_v39 = vadd.f32 1.0, %v2574_v52  ;;  %v2434_v11 = vmul.f32 -1.442695, %v801_v38  ;;  %v1619_v25 = vadd.f32 %v3532_v55, %v3512_v44 }
 0x1e0   : > { %v2578_v20 = vpop.eup %2577  ;;  %v1646_v59 = vadd.f32 1.0, %v2576_v42  ;;  %v774_v49 = vadd.f32 %v766_v19, %v735_v17  ;;  %v803_v48 = vadd.f32 %v3466_v27, %v772_v45  ;;  %v2846_v42 = vmov 0.0   ;;  %v950_v45 = vpop.permute.xlu1 %949  ;;  %v3945_v17 = vld [vmem:[#allocation39_spill] sm:$0xff] }
 0x1e1   : > { %v2580_v40 = vpop.eup %2579  ;;  %2593 = vrcp.f32 %v1645_v39  ;;  %v1647_v54 = vadd.f32 1.0, %v2578_v20  ;;  %v2455_v18 = vmul.f32 -1.442695, %v1619_v25  ;;  %2222 = vmatprep.mubr.f32.mxu0 %v2846_v42  ;;  %2142 = vmatprep.mubr.f32.mxu1 %v2846_v42  ;;  %v1759_v39 = vrot.slane %v950_v45, 6 }
 0x1e2   : > { %v2582_v16 = vpop.eup %2581  ;;  %2595 = vrcp.f32 %v1646_v59  ;;  %v1648_v10 = vadd.f32 1.0, %v2580_v40  ;;  %v805_v28 = vadd.f32 %v3470_v60, %v774_v49  ;;  %v2436_v35 = vmul.f32 -1.442695, %v803_v48 }
 0x1e3   : > { %v2584_v51 = vpop.eup %2583  ;;  %2597 = vpow2.f32 %v2439_v36  ;;  %v1649_v30 = vadd.f32 1.0, %v2582_v16  ;;  %v1757_v36 = vrot.slane %v950_v45, 4  ;;  %v1767_v38 = vadd.f32 %v1759_v39, %v3527_v32  ;;  %v3947_v32 = vld [vmem:[#allocation41_spill] sm:$0xff] }
 0x1e4   : > { %2599 = vpow2.f32 %v2456_v6  ;;  %v1650_v34 = vadd.f32 1.0, %v2584_v51  ;;  %v2438_v13 = vmul.f32 -1.442695, %v805_v28  ;;  %v952_v6 = vrot.slane %v950_v45, 2 }
 0x1e5   : > { %2601 = vrcp.f32 %v1647_v54  ;;  %v2586_v41 = vpop.eup %2585  ;;  %v1765_v20 = vadd.f32 %v1757_v36, %v3520_v23  ;;  %v2459_v40 = vmul.f32 -1.442695, %v1767_v38  ;;  %v3944_v54 = vld [vmem:[#allocation38_spill] sm:$0xff]  ;;  %v1758_v51 = vrot.slane %v950_v45, 5  ;;  %v3946_v23 = vld [vmem:[#allocation40_spill] sm:$0xff] }
 0x1e6   : > { %2603 = vrcp.f32 %v1648_v10  ;;  %v2588_v46 = vpop.eup %2587  ;;  %v832_v43 = vadd.f32 1.0, %v2586_v41  ;;  %v958_v16 = vadd.f32 %v950_v45, %v3944_v54  ;;  %v960_v10 = vadd.f32 %v952_v6, %v3945_v17 }
 0x1e7   : > { %2605 = vpow2.f32 %v2434_v11  ;;  %v2590_v29 = vpop.eup %2589  ;;  %v836_v61 = vadd.f32 1.0, %v2588_v46  ;;  %v2457_v59 = vmul.f32 -1.442695, %v1765_v20  ;;  %v953_v49 = vrot.slane %v950_v45, 3 }
 0x1e8   : > { %2607 = vrcp.f32 %v1649_v30  ;;  %v2592_v50 = vpop.eup %2591  ;;  %v834_v60 = vadd.f32 1.0, %v2590_v29  ;;  %v2441_v48 = vmul.f32 -1.442695, %v958_v16  ;;  %v951_v11 = vrot.slane %v950_v45, 1 }
 0x1e9   : > { %2609 = vrcp.f32 %v1650_v34  ;;  %v839_v58 = vadd.f32 1.0, %v2592_v50  ;;  %v2443_v30 = vmul.f32 -1.442695, %v960_v10  ;;  %v1760_v41 = vrot.slane %v950_v45, 7 }
 0x1ea   : > { %2611 = vpow2.f32 %v2436_v35  ;;  %v1766_v34 = vadd.f32 %v1758_v51, %v3522_v62  ;;  %v961_v46 = vadd.f32 %v953_v49, %v3946_v23  ;;  %v959_v28 = vadd.f32 %v951_v11, %v3947_v32 }
 0x1eb   : > { %v2594_v12 = vpop.eup %2593  ;;  %2613 = vrcp.f32 %v832_v43  ;;  %v1768_v35 = vadd.f32 %v1760_v41, %v3549_v14 }
 0x1ec   : > { %v2596_v27 = vpop.eup %2595  ;;  %1795 = vperm.xlu1 %2567, %v2594_v12   ;;  %2615 = vrcp.f32 %v836_v61  ;;  %v2458_v29 = vmul.f32 -1.442695, %v1766_v34  ;;  %v2444_v43 = vmul.f32 -1.442695, %v961_v46  ;;  %v2442_v50 = vmul.f32 -1.442695, %v959_v28 }
 0x1ed   : > { %v2598_v37 = vpop.eup %2597  ;;  %1800 = vperm.xlu0 %2568, %v2596_v27   ;;  %2617 = vpow2.f32 %v2438_v13  ;;  %v2460_v12 = vmul.f32 -1.442695, %v1768_v35 }
 0x1ee   : > { %v2600_v53 = vpop.eup %2599  ;;  %2619 = vrcp.f32 %v834_v60  ;;  %v838_v4 = vadd.f32 1.0, %v2598_v37 }
 0x1ef   : > { %v2602_v63 = vpop.eup %2601  ;;  %2621 = vrcp.f32 %v839_v58  ;;  %v1652_v5 = vadd.f32 1.0, %v2600_v53 }
 0x1f0   : > { %v2604_v21 = vpop.eup %2603  ;;  %1805 = vperm.xlu1 %2567, %v2602_v63   ;;  %2623 = vpow2.f32 %v2455_v18 }
 0x1f1   : > { %1810 = vperm.xlu0 %2568, %v2604_v21   ;;  %v2606_v47 = vpop.eup %2605  ;;  %2625 = vrcp.f32 %v838_v4 }
 0x1f2   : > { %v2608_v44 = vpop.eup %2607  ;;  %v833_v56 = vadd.f32 1.0, %v2606_v47  ;;  %2627 = vrcp.f32 %v1652_v5 }
 0x1f3   : > { %v2610_v55 = vpop.eup %2609 }
 0x1f4   : > { %1815 = vperm.xlu1 %2567, %v2608_v44   ;;  %v2612_v1 = vpop.eup %2611  ;;  %2629 = vrcp.f32 %v833_v56 }
 0x1f5   : > { %1820 = vperm.xlu0 %2568, %v2610_v55   ;;  %v2614_v33 = vpop.eup %2613  ;;  %v835_v22 = vadd.f32 1.0, %v2612_v1 }
 0x1f6   : > { %v2616_v15 = vpop.eup %2615 }
 0x1f7   : > { %v2618_v31 = vpop.eup %2617  ;;  %2631 = vrcp.f32 %v835_v22  ;;  %v3948_v22 = vld [vmem:[#allocation36_spill] sm:$0xff] }
 0x1f8   : > { %988 = vperm.xlu1 %2567, %v2614_v33   ;;  %v2620_v24 = vpop.eup %2619  ;;  %v837_v8 = vadd.f32 1.0, %v2618_v31 }
 0x1f9   : > { %1008 = vperm.xlu0 %2568, %v2616_v15   ;;  %v2622_v7 = vpop.eup %2621 }
 0x1fa   : > { %v2624_v2 = vpop.eup %2623  ;;  %2633 = vrcp.f32 %v837_v8 }
 0x1fb   : > { %v2626_v0 = vpop.eup %2625  ;;  %v1651_v52 = vadd.f32 1.0, %v2624_v2 }
 0x1fc   : > { %998 = vperm.xlu1 %2567, %v2620_v24   ;;  %v2628_v3 = vpop.eup %2627 }
 0x1fd   : > { %1023 = vperm.xlu0 %2568, %v2622_v7   ;;  %2635 = vrcp.f32 %v1651_v52 }
 0x1fe   : > { %v2630_v57 = vpop.eup %2629  ;;  %2637 = vpow2.f32 %v2457_v59 }
 0x1ff   : > { %2639 = vpow2.f32 %v2459_v40 }
 0x200   : > { %1018 = vperm.xlu1 %2567, %v2626_v0   ;;  %2641 = vpow2.f32 %v2441_v48 }
 0x201   : > { %1830 = vperm.xlu0 %2568, %v2628_v3   ;;  %v2632_v26 = vpop.eup %2631  ;;  %2643 = vpow2.f32 %v2443_v30 }
 0x202   : > { %2645 = vpow2.f32 %v2458_v29 }
 0x203   : > { %2647 = vpow2.f32 %v2444_v43 }
 0x204   : > { %993 = vperm.xlu1 %2567, %v2630_v57   ;;  %v2634_v9 = vpop.eup %2633  ;;  %2649 = vpow2.f32 %v2442_v50 }
 0x205   : > { %2651 = vpow2.f32 %v2460_v12 }
 0x207   : > { %v2636_v19 = vpop.eup %2635 }
 0x208   : > { %1003 = vperm.xlu1 %2567, %v2632_v26   ;;  %v2638_v61 = vpop.eup %2637 }
 0x209   : > { %v2640_v27 = vpop.eup %2639  ;;  %v1781_v13 = vadd.f32 1.0, %v2638_v61 }
 0x20a   : > { %v1783_v25 = vadd.f32 1.0, %v2640_v27  ;;  %v2642_v62 = vpop.eup %2641 }
 0x20b   : > { %v2644_v37 = vpop.eup %2643  ;;  %2653 = vrcp.f32 %v1781_v13  ;;  %v974_v60 = vadd.f32 1.0, %v2642_v62 }
 0x20c   : > { %1013 = vperm.xlu1 %2567, %v2634_v9   ;;  %2655 = vrcp.f32 %v1783_v25  ;;  %v976_v53 = vadd.f32 1.0, %v2644_v37  ;;  %v2646_v58 = vpop.eup %2645  ;;  %v3949_v25 = vld [vmem:[#allocation14_spill] sm:$0xff] }
 0x20d   : > { %v2648_v14 = vpop.eup %2647  ;;  %2657 = vrcp.f32 %v974_v60  ;;  %v1782_v4 = vadd.f32 1.0, %v2646_v58 }
 0x20e   : > { %v2650_v63 = vpop.eup %2649  ;;  %2659 = vrcp.f32 %v976_v53  ;;  %v977_v5 = vadd.f32 1.0, %v2648_v14 }
 0x20f   : > { %v2652_v21 = vpop.eup %2651  ;;  %v975_v44 = vadd.f32 1.0, %v2650_v63  ;;  %2661 = vrcp.f32 %v1782_v4 }
 0x210   : > { %1825 = vperm.xlu1 %2567, %v2636_v19   ;;  %v1784_v56 = vadd.f32 1.0, %v2652_v21  ;;  %2663 = vrcp.f32 %v977_v5 }
 0x211   : > { %2665 = vrcp.f32 %v975_v44 }
 0x212   : > { %2667 = vrcp.f32 %v1784_v56 }
 0x215   : > { %v2654_v55 = vpop.eup %2653 }
 0x216   : > { %v2656_v1 = vpop.eup %2655  ;;  %v1836_v31 = vrot.slane %v2654_v55, %v3948_v22 }
 0x217   : > { %v1844_v24 = vrot.slane %v2656_v1, %v3948_v22  ;;  %v2658_v7 = vpop.eup %2657 }
 0x218   : > { %v2660_v2 = vpop.eup %2659  ;;  %v1029_v45 = vrot.slane %v2658_v7, %v3948_v22 }
 0x219   : > { %v1037_v20 = vrot.slane %v2660_v2, %v3948_v22  ;;  %v2662_v40 = vpop.eup %2661 }
 0x21a   : > { %v2664_v16 = vpop.eup %2663  ;;  %v1840_v34 = vrot.slane %v2662_v40, %v3948_v22 }
 0x21b   : > { %v2666_v17 = vpop.eup %2665  ;;  %v1041_v30 = vrot.slane %v2664_v16, %v3948_v22 }
 0x21c   : > { %v2668_v48 = vpop.eup %2667  ;;  %v1033_v41 = vrot.slane %v2666_v17, %v3948_v22 }
 0x21d   : > { %v1848_v23 = vrot.slane %v2668_v48, %v3948_v22 }
 0x26b   : > { %v1796_v18 = vpop.permute.xlu1 %1795 }
 0x26c   : > { %v1801_v47 = vpop.permute.xlu0 %1800  ;;  %v3574_v0 = vmul.f32 %v1836_v31, %v1796_v18 }
 0x26d   : > { %v1850_v57 = vmul.f32 %v1836_v31, %v1801_v47 }
 0x26f   : > { %v3570_v33 = vpop.permute.xlu1 %1805 }
 0x270   : > { %v1811_v15 = vpop.permute.xlu0 %1810 }
 0x271   : > { %v1852_v29 = vmul.f32 %v1840_v34, %v1811_v15 }
 0x273   : > { %v1816_v8 = vpop.permute.xlu1 %1815 }
 0x274   : > { %v1821_v3 = vpop.permute.xlu0 %1820  ;;  %v3576_v52 = vmul.f32 %v1844_v24, %v1816_v8 }
 0x275   : > { %v1854_v26 = vmul.f32 %v1844_v24, %v1821_v3  ;;  %v3950_v24 = vld [vmem:[#allocation15_spill] sm:$0xff] }
 0x276   : > { %v1857_v9 = vcombine.low %v3574_v0, %v3576_v52  ;;  %v1858_v19 = vcombine.high %v3574_v0, %v3576_v52 }
 0x277   : > { %v1925_v36 = vcombine.low %v1850_v57, %v1854_v26  ;;  %v1926_v39 = vcombine.high %v1850_v57, %v1854_v26  ;;  %v989_v38 = vpop.permute.xlu1 %988 }
 0x278   : > { %v1009_v6 = vpop.permute.xlu0 %1008  ;;  %v1042_v59 = vmul.f32 %v1029_v45, %v989_v38 }
 0x279   : > { %v1046_v54 = vmul.f32 %v1037_v20, %v1009_v6  ;;  %v1933_v58 = vrot.slane %v1925_v36, %v3949_v25  ;;  %v1940_v14 = vrot.slane %v1926_v39, %v3949_v25  ;;  %v1851_v6 = vmul.f32 %v1840_v34, %v3570_v33 }
 0x27a   : > { %v1872_v34 = vrot.slane %v1858_v19, %v3949_v25 }
 0x27b   : > { %v1050_v10 = vcombine.low %v1042_v59, %v1046_v54  ;;  %v1051_v51 = vcombine.high %v1042_v59, %v1046_v54  ;;  %v999_v49 = vpop.permute.xlu1 %998 }
 0x27c   : > { %v1024_v11 = vpop.permute.xlu0 %1023  ;;  %v1044_v32 = vmul.f32 %v1033_v41, %v999_v49 }
 0x27d   : > { %v3589_v62 = vrot.slane %v1050_v10, %v3949_v25  ;;  %v3592_v37 = vrot.slane %v1051_v51, %v3949_v25  ;;  %v1049_v22 = vmul.f32 %v1041_v30, %v1024_v11 }
 0x27f   : > { %v1019_v46 = vpop.permute.xlu1 %1018 }
 0x280   : > { %v1831_v28 = vpop.permute.xlu0 %1830  ;;  %v1048_v35 = vmul.f32 %v1041_v30, %v1019_v46 }
 0x281   : > { %v1856_v43 = vmul.f32 %v1848_v23, %v1831_v28 }
 0x282   : > { %v1066_v50 = vcombine.low %v1044_v32, %v1048_v35  ;;  %v1067_v61 = vcombine.high %v1044_v32, %v1048_v35 }
 0x283   : > { %v1941_v12 = vcombine.low %v1852_v29, %v1856_v43  ;;  %v1942_v27 = vcombine.high %v1852_v29, %v1856_v43  ;;  %v994_v13 = vpop.permute.xlu1 %993 }
 0x284   : > { %v3595_v60 = vrot.slane %v1066_v50, %v3949_v25  ;;  %v3598_v53 = vrot.slane %v1067_v61, %v3949_v25  ;;  %v1043_v57 = vmul.f32 %v1029_v45, %v994_v13 }
 0x285   : > { %v1949_v63 = vrot.slane %v1941_v12, %v3949_v25  ;;  %v1956_v21 = vrot.slane %v1942_v27, %v3949_v25 }
 0x286   : > { %v1082_v18 = vcombine.low %v3589_v62, %v3595_v60  ;;  %v1083_v4 = vcombine.high %v3589_v62, %v3595_v60  ;;  %v1098_v47 = vcombine.low %v3592_v37, %v3598_v53  ;;  %v1099_v5 = vcombine.high %v3592_v37, %v3598_v53 }
 0x287   : > { %v1957_v44 = vcombine.low %v1933_v58, %v1949_v63  ;;  %v1004_v55 = vpop.permute.xlu1 %1003  ;;  %v1958_v56 = vcombine.high %v1933_v58, %v1949_v63  ;;  %v1973_v1 = vcombine.low %v1940_v14, %v1956_v21  ;;  %v1974_v15 = vcombine.high %v1940_v14, %v1956_v21 }
 0x288   : > { %v1045_v31 = vmul.f32 %v1033_v41, %v1004_v55  ;;  %v1865_v41 = vrot.slane %v1857_v9, %v3949_v25  ;;  %v2847_v53 = vmov 6  }
 0x289   : > { %v1972_v7 = vrot.slane %v1958_v56, %v3950_v24  ;;  %v1981_v36 = vrot.slane %v1973_v1, %v3950_v24  ;;  %v1988_v45 = vrot.slane %v1974_v15, %v3950_v24  ;;  %v1106_v56 = vrot.slane %v1098_v47, %v3950_v24  ;;  %2569 = vset.pattern.permute.xlu1 %v2847_v53 }
 0x28a   : > { %v1134_v8 = vcombine.low %v1045_v31, %v1049_v22  ;;  %v1135_v2 = vcombine.high %v1045_v31, %v1049_v22  ;;  %v3693_v15 = vrot.slane %v1082_v18, %v3950_v24  ;;  %v2848_v18 = vmov 7  }
 0x28b   : > { %2026 = vrot.lane.b32.xlu0 %v1972_v7, %s2836_s23  ;;  %v1014_v3 = vpop.permute.xlu1 %1013  ;;  %v1990_v50 = vcombine.high %v1972_v7, %v2846_v42  ;;  %v1991_v52 = vcombine.high %v1981_v36, %v2846_v42  ;;  %v1992_v31 = vcombine.high %v1988_v45, %v2846_v42  ;;  %v1116_v37 = vcombine.high %v1106_v56, %v2846_v42  ;;  %v3715_v7 = vld [vmem:[%s3044_s30] sm:$0xff]  ;;  %s2425_s30 = sld [smem:[#allocation6 + $0x1]] }
 0x28c   : > { %v1047_v26 = vmul.f32 %v1037_v20, %v1014_v3  ;;  %v1142_v40 = vrot.slane %v1134_v8, %v3949_v25  ;;  %v1149_v10 = vrot.slane %v1135_v2, %v3949_v25  ;;  %v3623_v20 = vrot.slane %v1957_v44, %v3950_v24  ;;  %2570 = vset.pattern.permute.xlu0 %v2848_v18  ;;  %v3721_v2 = vld [vmem:[%s289_s10] sm:$0xff]  ;;  %s3737_s10 = sld [smem:[#allocation6]] }
 0x28d   : > { %v1097_v44 = vrot.slane %v1083_v4, %v3950_v24  ;;  %v1113_v4 = vrot.slane %v1099_v5, %v3950_v24  ;;  %v1114_v47 = vcombine.high %v3693_v15, %v2846_v42  ;;  %v349_v8 = vcombine.high %v3715_v7, %v3715_v7 }
 0x28e   : > { %v1118_v39 = vcombine.low %v1043_v57, %v1047_v26  ;;  %v1119_v38 = vcombine.high %v1043_v57, %v1047_v26  ;;  %v1989_v32 = vcombine.high %v3623_v20, %v2846_v42  ;;  %v352_v3 = vsel %vm351_vm1, %v3715_v7, 0.0 }
 0x28f   : > { %2034 = vrot.lane.b32.xlu0 %v1981_v36, %s2834_s14  ;;  %v1826_v59 = vpop.permute.xlu1 %1825  ;;  %v1115_v62 = vcombine.high %v1097_v44, %v2846_v42  ;;  %v1117_v60 = vcombine.high %v1113_v4, %v2846_v42  ;;  %v369_v57 = vsel %vm351_vm1, %v3721_v2, 0.0  ;;  %v385_v26 = vsel %vm351_vm1, %v3715_v7, -inf }
 0x290   : > { %v1126_v54 = vrot.slane %v1118_v39, %v3949_v25  ;;  %v1133_v16 = vrot.slane %v1119_v38, %v3949_v25  ;;  %v1855_v17 = vmul.f32 %v1848_v23, %v1826_v59  ;;  %v399_v36 = vsel %vm351_vm1, %v3721_v2, -inf }
 0x291   : > { %v359_v39 = vsel %vm351_vm1, %v349_v8, 0.0 }
 0x292   : > { %v1150_v51 = vcombine.low %v1126_v54, %v1142_v40  ;;  %v1873_v49 = vcombine.low %v1851_v6, %v1855_v17  ;;  %v1874_v33 = vcombine.high %v1851_v6, %v1855_v17  ;;  %v1151_v48 = vcombine.high %v1126_v54, %v1142_v40 }
 0x293   : > { %2042 = vrot.lane.b32.xlu0 %v1988_v45, %s2835_s19  ;;  %v1166_v11 = vcombine.low %v1133_v16, %v1149_v10  ;;  %v1167_v30 = vcombine.high %v1133_v16, %v1149_v10  ;;  %v392_v6 = vsel %vm351_vm1, %v349_v8, -inf  ;;  %v353_v40 = vrot.slane %v352_v3, 4 }
 0x294   : > { %v1881_v23 = vrot.slane %v1873_v49, %v3949_v25  ;;  %v1888_v46 = vrot.slane %v1874_v33, %v3949_v25  ;;  %v1165_v12 = vrot.slane %v1151_v48, %v3950_v24  ;;  %v3662_v14 = vrot.slane %v1150_v51, %v3950_v24 }
 0x295   : > { %v1174_v13 = vrot.slane %v1166_v11, %v3950_v24  ;;  %v1181_v58 = vrot.slane %v1167_v30, %v3950_v24  ;;  %v370_v54 = vrot.slane %v369_v57, 4  ;;  %v386_v16 = vrot.slane %v385_v26, 4 }
 0x296   : > { %v1889_v28 = vcombine.low %v1865_v41, %v1881_v23  ;;  %v1890_v35 = vcombine.high %v1865_v41, %v1881_v23  ;;  %v1905_v29 = vcombine.low %v1872_v34, %v1888_v46  ;;  %v1906_v43 = vcombine.high %v1872_v34, %v1888_v46 }
 0x297   : > { %2022 = vrot.lane.b32.xlu0 %v1989_v32, %s2838_s12  ;;  %v1182_v21 = vcombine.high %v3662_v14, %v2846_v42  ;;  %v1183_v55 = vcombine.high %v1165_v12, %v2846_v42  ;;  %v1184_v1 = vcombine.high %v1174_v13, %v2846_v42  ;;  %v1185_v22 = vcombine.high %v1181_v58, %v2846_v42 }
 0x298   : > { %v1904_v9 = vrot.slane %v1890_v35, %v3950_v24  ;;  %v1913_v0 = vrot.slane %v1905_v29, %v3950_v24  ;;  %v1920_v19 = vrot.slane %v1906_v43, %v3950_v24  ;;  %v3649_v61 = vrot.slane %v1889_v28, %v3950_v24  ;;  %v2677_v24 = vld [vmem:[%s3870_s3] sm:$0xff] }
 0x299   : > { %v400_v17 = vrot.slane %v399_v36, 4  ;;  %v360_v10 = vrot.slane %v359_v39, 4  ;;  %v393_v51 = vrot.slane %v392_v6, 4  ;;  %v354_v33 = vadd.f32 %v353_v40, %v352_v3 }
 0x29a   : > { %1998 = vrot.lane.b32.xlu1 %v1904_v9, %s2836_s23  ;;  %v1921_v27 = vcombine.high %v3649_v61, %v2846_v42  ;;  %v1922_v25 = vcombine.high %v1904_v9, %v2846_v42  ;;  %v1923_v63 = vcombine.high %v1913_v0, %v2846_v42  ;;  %v1924_v5 = vcombine.high %v1920_v19, %v2846_v42 }
 0x29b   : > { %2030 = vrot.lane.b32.xlu0 %v1990_v50, %s2837_s9  ;;  %v367_v42 = vcombine.high %v3721_v2, %v3721_v2  ;;  %v371_v48 = vadd.f32 %v370_v54, %v369_v57  ;;  %v387_v11 = vmax.f32 %v385_v26, %v386_v16  ;;  %v401_v30 = vmax.f32 %v399_v36, %v400_v17 }
 0x29c   : > { %v361_v41 = vadd.f32 %v360_v10, %v359_v39  ;;  %v394_v23 = vmax.f32 %v392_v6, %v393_v51  ;;  %v355_v32 = vrot.slane %v354_v33, 2  ;;  %v418_v6 = vstv %s2425_s30 }
 0x29d   : > { %v376_v38 = vsel %vm351_vm1, %v367_v42, 0.0  ;;  %v406_v59 = vsel %vm351_vm1, %v367_v42, -inf  ;;  %v372_v28 = vrot.slane %v371_v48, 2  ;;  %v388_v35 = vrot.slane %v387_v11, 2 }
 0x29e   : > { %2006 = vrot.lane.b32.xlu1 %v1913_v0, %s2834_s14  ;;  %v377_v45 = vrot.slane %v376_v38, 4  ;;  %v407_v49 = vrot.slane %v406_v59, 4  ;;  %v402_v29 = vrot.slane %v401_v30, 2  ;;  %v362_v43 = vrot.slane %v361_v41, 2 }
 0x29f   : > { %2038 = vrot.lane.b32.xlu0 %v1991_v52, %s2832_s17  ;;  %v395_v50 = vrot.slane %v394_v23, 2  ;;  %v356_v52 = vadd.f32 %v355_v32, %v354_v33 }
 0x2a0   : > { %v378_v34 = vadd.f32 %v377_v45, %v376_v38  ;;  %v408_v46 = vmax.f32 %v406_v59, %v407_v49  ;;  %v415_v38 = vstv %s3737_s10 }
 0x2a2   : > { %2014 = vrot.lane.b32.xlu1 %v1920_v19, %s2835_s19  ;;  %v379_v9 = vrot.slane %v378_v34, 2  ;;  %v409_v0 = vrot.slane %v408_v46, 2  ;;  %v373_v19 = vadd.f32 %v372_v28, %v371_v48 }
 0x2a3   : > { %1219 = vrot.lane.b32.xlu0 %v1165_v12, %s2836_s23  ;;  %v389_v12 = vmax.f32 %v387_v11, %v388_v35 }
 0x2a6   : > { %1994 = vrot.lane.b32.xlu1 %v1921_v27, %s2838_s12  ;;  %v403_v27 = vmax.f32 %v401_v30, %v402_v29 }
 0x2a7   : > { %1227 = vrot.lane.b32.xlu0 %v1174_v13, %s2834_s14  ;;  %v363_v13 = vadd.f32 %v362_v43, %v361_v41 }
 0x2aa   : > { %2002 = vrot.lane.b32.xlu1 %v1922_v25, %s2837_s9  ;;  %v380_v25 = vadd.f32 %v379_v9, %v378_v34 }
 0x2ab   : > { %1235 = vrot.lane.b32.xlu0 %v1181_v58, %s2835_s19  ;;  %v396_v58 = vmax.f32 %v394_v23, %v395_v50 }
 0x2ae   : > { %2010 = vrot.lane.b32.xlu1 %v1923_v63, %s2832_s17  ;;  %v410_v63 = vmax.f32 %v408_v46, %v409_v0 }
 0x2af   : > { %1215 = vrot.lane.b32.xlu0 %v1182_v21, %s2838_s12  ;;  %v357_v21 = vrot.slane %v356_v52, 1 }
 0x2b2   : > { %1191 = vrot.lane.b32.xlu1 %v1097_v44, %s2836_s23  ;;  %v374_v44 = vrot.slane %v373_v19, 1  ;;  %s2725_s23 = scalar_lea.vmem %s3796_s15, 128 }
 0x2b3   : > { %1223 = vrot.lane.b32.xlu0 %v1183_v55, %s2837_s9  ;;  %v390_v55 = vrot.slane %v389_v12, 1  ;;  %p2726_p11 = scmp.ne.s32.totalorder %s3796_s15, %s2725_s23 }
 0x2b5   : > { %p2727_p7 = pnand %p2726_p11, %p3951_p13 }
 0x2b6   : > { %1199 = vrot.lane.b32.xlu1 %v1106_v56, %s2834_s14  ;;  %v404_v56 = vrot.slane %v403_v27, 1  ;;  %s2285_s14 = sshll.u32 %s334_s16, 4  ;;  %s3803_s14 = int_to_ptr.vmem [resolvable:$true] %s2285_s14 }
 0x2b7   : > { %1231 = vrot.lane.b32.xlu0 %v1184_v1, %s2832_s17  ;;  %p2728_p0 = pneg %p2727_p7 }
 0x2b8   : > { %v405_v53 = vmax.f32 %v403_v27, %v404_v56 }
 0x2ba   : > { %1207 = vrot.lane.b32.xlu1 %v1113_v4, %s2835_s19  ;;  %v364_v4 = vrot.slane %v363_v13, 1 }
 0x2bb   : > { %1239 = vrot.lane.b32.xlu0 %v1185_v22, %s2833_s22  ;;  %v381_v22 = vrot.slane %v380_v25, 1 }
 0x2be   : > { %1187 = vrot.lane.b32.xlu1 %v1114_v47, %s2838_s12  ;;  %v397_v47 = vrot.slane %v396_v58, 1  ;;  %s2477_s12 = sshll.u32 %s2912_s28, 7 }
 0x2bf   : > { %2046 = vrot.lane.b32.xlu0 %v1992_v31, %s2833_s22  ;;  %v411_v31 = vrot.slane %v410_v63, 1  ;;  %s3801_s28 = scalar_lea.hbm %s3874_s7, %s2477_s12 }
 0x2c0   : > { %v398_v8 = vmax.f32 %v396_v58, %v397_v47 }
 0x2c1   : > { %v412_v42 = vmax.f32 %v410_v63, %v411_v31 }
 0x2c2   : > { %1195 = vrot.lane.b32.xlu1 %v1115_v62, %s2837_s9  ;;  %v358_v62 = vadd.f32 %v357_v21, %v356_v52  ;;  %s2849_s9 = smov [#allocation7]  }
 0x2c3   : > { %2236 = vperm.xlu0 %2570, %v2677_v24   ;;  %v414_v39 = vmax.f32 %v398_v8, %v412_v42  ;;  %s2729_s10 = sshll.u32 %s2849_s9, 4  ;;  %s2730_s10 = int_to_ptr.vmem [resolvable:$false] %s2729_s10 }
 0x2c4   : > { %s2731_s30 = scalar_lea.vmem %s2730_s10, 256  ;;  %p2732_p3 = scmp.lt.s32.totalorder %s3796_s15, %s2730_s10 }
 0x2c5   : > { %v420_v17 = vmul.f32 %v418_v6, %v414_v39  ;;  %p2733_p12 = scmp.lt.s32.totalorder %s2731_s30, %s2725_s23 }
 0x2c6   : > { %1203 = vrot.lane.b32.xlu1 %v1116_v37, %s2832_s17  ;;  %v375_v37 = vadd.f32 %v374_v44, %v373_v19  ;;  %s2426_s17 = sld [smem:[#allocation6 + $0x2]] }
 0x2c7   : > { %p2734_p5 = por %p2733_p12, %p2732_p3 }
 0x2c8   : > { %v383_v3 = vadd.f32 %v375_v37, %v358_v62 }
 0x2c9   : > { %p2735_p10 = pnand %p2734_p5, %p2728_p0 }
 0x2ca   : > { %1211 = vrot.lane.b32.xlu1 %v1117_v60, %s2833_s22  ;;  %v391_v60 = vmax.f32 %v389_v12, %v390_v55  ;;  %v416_v59 = vmul.f32 %v415_v38, %v383_v3 }
 0x2cc   : > { %v413_v57 = vmax.f32 %v391_v60, %v405_v53  ;;  %v423_v33 = vstv %s2426_s17  ;;  %s3794_s17 = scalar_lea.hbm %s3873_s6, %s2477_s12 }
 0x2ce   : > { %2018 = vrot.lane.b32.xlu1 %v1924_v5, %s2833_s22  ;;  %v365_v5 = vadd.f32 %v364_v4, %v363_v13  ;;  %v419_v40 = vmul.f32 %v418_v6, %v413_v57 }
 0x2d0   : > { %v421_v45 = vadd.f32 %v419_v40, %v416_v59 }
 0x2d2   : > { %2230 = vperm.xlu1 %2569, %v2677_v24   ;;  %v382_v24 = vadd.f32 %v381_v22, %v380_v25  ;;  %v424_v11 = vadd.f32 %v423_v33, %v421_v45 }
 0x2d4   : > { %v384_v36 = vadd.f32 %v382_v24, %v365_v5  ;;  %v2427_v23 = vmul.f32 -1.442695, %v424_v11 }
 0x2d6   : > { %v417_v16 = vmul.f32 %v415_v38, %v384_v36  ;;  %2669 = vpow2.f32 %v2427_v23 }
 0x2d8   : > { %v422_v49 = vadd.f32 %v420_v17, %v417_v16 }
 0x2da   : > { %v425_v41 = vadd.f32 %v423_v33, %v422_v49 }
 0x2dc   : > { %v2428_v32 = vmul.f32 -1.442695, %v425_v41 }
 0x2de   : > { %2671 = vpow2.f32 %v2428_v32 }
 0x2e0   : > { %v2670_v50 = vpop.eup %2669 }
 0x2e1   : > { %v432_v19 = vadd.f32 1.0, %v2670_v50 }
 0x2e3   : > { %2673 = vrcp.f32 %v432_v19 }
 0x2e8   : > { %v2672_v0 = vpop.eup %2671 }
 0x2e9   : > { %v433_v27 = vadd.f32 1.0, %v2672_v0 }
 0x2eb   : > { %2675 = vrcp.f32 %v433_v27 }
 0x2ed   : > { %v2674_v56 = vpop.eup %2673 }
 0x2f5   : > { %v2676_v4 = vpop.eup %2675 }
 0x2fd   : > { %v3739_v1 = vpop.permute.xlu0 %2026 }
 0x301   : > { %v3741_v18 = vpop.permute.xlu0 %2034 }
 0x305   : > { %v3743_v26 = vpop.permute.xlu0 %2042 }
 0x309   : > { %v2023_v54 = vpop.permute.xlu0 %2022 }
 0x30a   : > { %v2056_v62 = vsel %vm648_vm0, %v3623_v20, %v2023_v54 }
 0x30b   : > { %v2057_v53 = vsel %vm1243_vm2, %v2056_v62, %v3739_v1 }
 0x30c   : > { %v1999_v10 = vpop.permute.xlu1 %1998 }
 0x30d   : > { %v2031_v51 = vpop.permute.xlu0 %2030 }
 0x30e   : > { %v2058_v20 = vsel %vm1245_vm3, %v2057_v53, %v2031_v51 }
 0x30f   : > { %v2059_v1 = vsel %vm1247_vm4, %v2058_v20, %v3741_v18 }
 0x310   : > { %v2007_v48 = vpop.permute.xlu1 %2006 }
 0x311   : > { %v2039_v30 = vpop.permute.xlu0 %2038 }
 0x312   : > { %v2060_v54 = vsel %vm1249_vm5, %v2059_v1, %v2039_v30 }
 0x314   : > { %v3746_v34 = vpop.permute.xlu1 %2014 }
 0x315   : > { %v1220_v46 = vpop.permute.xlu0 %1219 }
 0x318   : > { %v1995_v28 = vpop.permute.xlu1 %1994 }
 0x319   : > { %v1228_v35 = vpop.permute.xlu0 %1227  ;;  %v2049_v37 = vsel %vm648_vm0, %v3649_v61, %v1995_v28 }
 0x31a   : > { %v2050_v5 = vsel %vm1243_vm2, %v2049_v37, %v1999_v10 }
 0x31c   : > { %v2003_v29 = vpop.permute.xlu1 %2002 }
 0x31d   : > { %v1236_v43 = vpop.permute.xlu0 %1235  ;;  %v2051_v61 = vsel %vm1245_vm3, %v2050_v5, %v2003_v29 }
 0x31e   : > { %v2052_v38 = vsel %vm1247_vm4, %v2051_v61, %v2007_v48 }
 0x320   : > { %v2011_v9 = vpop.permute.xlu1 %2010 }
 0x321   : > { %v1216_v12 = vpop.permute.xlu0 %1215  ;;  %v2053_v16 = vsel %vm1249_vm5, %v2052_v38, %v2011_v9 }
 0x322   : > { %v1255_v21 = vsel %vm648_vm0, %v3662_v14, %v1216_v12  ;;  %v2054_v49 = vsel %vm1251_vm7, %v2053_v16, %v3746_v34 }
 0x323   : > { %v1256_v22 = vsel %vm1243_vm2, %v1255_v21, %v1220_v46  ;;  %v341_v46 = vld [vmem:[%s3871_s4] sm:$0xff] }
 0x324   : > { %v1192_v52 = vpop.permute.xlu1 %1191 }
 0x325   : > { %v1224_v25 = vpop.permute.xlu0 %1223 }
 0x326   : > { %v1257_v60 = vsel %vm1245_vm3, %v1256_v22, %v1224_v25 }
 0x327   : > { %v1258_v24 = vsel %vm1247_vm4, %v1257_v60, %v1228_v35 }
 0x328   : > { %v1200_v13 = vpop.permute.xlu1 %1199 }
 0x329   : > { %v1232_v55 = vpop.permute.xlu0 %1231 }
 0x32a   : > { %v1259_v57 = vsel %vm1249_vm5, %v1258_v24, %v1232_v55 }
 0x32b   : > { %v1260_v6 = vsel %vm1251_vm7, %v1259_v57, %v1236_v43 }
 0x32c   : > { %v1208_v58 = vpop.permute.xlu1 %1207 }
 0x32d   : > { %v1240_v8 = vpop.permute.xlu0 %1239 }
 0x32e   : > { %v1261_v17 = vsel %vm1253_vm6, %v1260_v6, %v1240_v8 }
 0x330   : > { %v1188_v63 = vpop.permute.xlu1 %1187 }
 0x331   : > { %v1242_v44 = vsel %vm648_vm0, %v3693_v15, %v1188_v63  ;;  %v440_v15 = vcombine.low %v2674_v56, %v2676_v4  ;;  %v2047_v45 = vpop.permute.xlu0 %2046 }
 0x332   : > { %v1244_v47 = vsel %vm1243_vm2, %v1242_v44, %v1192_v52 }
 0x333   : > { %v442_v39 = vmul.f32 %v3715_v7, %v440_v15  ;;  %v2061_v7 = vsel %vm1251_vm7, %v2060_v54, %v3743_v26  ;;  %v1267_v48 = vmul.f32 %v3721_v2, %v440_v15  ;;  %v342_v2 = vld [vmem:[%s3872_s5] sm:$0xff] }
 0x334   : > { %v1196_v31 = vpop.permute.xlu1 %1195  ;;  %v2062_v11 = vsel %vm1253_vm6, %v2061_v7, %v2047_v45 }
 0x335   : > { %v1246_v14 = vsel %vm1245_vm3, %v1244_v47, %v1196_v31 }
 0x336   : > { %v1248_v42 = vsel %vm1247_vm4, %v1246_v14, %v1200_v13 }
 0x338   : > { %v1204_v3 = vpop.permute.xlu1 %1203 }
 0x339   : > { %v1250_v36 = vsel %vm1249_vm5, %v1248_v42, %v1204_v3 }
 0x33a   : > { %v1252_v59 = vsel %vm1251_vm7, %v1250_v36, %v1208_v58 }
 0x33c   : > { %v1212_v40 = vpop.permute.xlu1 %1211 }
 0x33d   : > { %v1254_v10 = vsel %vm1253_vm6, %v1252_v59, %v1212_v40 }
 0x33e   : > { %v1264_v51 = vcombine.low %v1254_v10, %v1261_v17 }
 0x340   : > { %v2019_v18 = vpop.permute.xlu1 %2018  ;;  %v1266_v33 = vmul.f32 %v1264_v51, %v442_v39 }
 0x341   : > { %v2055_v30 = vsel %vm1253_vm6, %v2054_v49, %v2019_v18 }
 0x342   : > { %v2065_v41 = vcombine.low %v2055_v30, %v2062_v11  ;;  %v2150_v23 = vcombine.high %v1266_v33, %v1266_v33  ;;  %v2237_v0 = vpop.permute.xlu0 %2236 }
 0x344   : > { %2464 = vmatprep.subr.msk.mxu0 %vm351_vm1, %v2150_v23  ;;  %v2067_v26 = vmul.f32 %v2065_v41, %v1267_v48 }
 0x345   : > { %2465 = vmatpush1.msk.msra.mxu0 %vm351_vm1, %v1266_v33 }
 0x346   : > { %v2069_v34 = vcombine.high %v2067_v26, %v2067_v26  ;;  %2466 = vmatmul.mubr.msk.f32.vlgmr.msra.gmra.mrb[0].mxu0 %vm2070_vm8, %v341_v46 }
 0x348   : > { %2461 = vmatprep.subr.msk.mxu1 %vm351_vm1, %v2069_v34 }
 0x349   : > { %2462 = vmatpush1.msk.msra.mxu1 %vm351_vm1, %v2067_v26 }
 0x34a   : > { %2463 = vmatmul.mubr.msk.f32.vlgmr.msra.gmra.mrb[0].mxu1 %vm2070_vm8, %v342_v2 }
 0x351   : > { %v2231_v29 = vpop.permute.xlu1 %2230 }
 0x419   : > { %v2224_v32 = vpop.f32.mrb[0].mxu0 }
 0x41a   : > { %v2226_v28 = vpop.f32.mrb[1].mxu0 }
 0x41d   : > { %v2144_v35 = vpop.f32.mrb[0].mxu1 }
 0x41e   : > { %v2225_v43 = vadd.f32 %v2224_v32, %v2144_v35  ;;  %v2146_v9 = vpop.f32.mrb[1].mxu1 }
 0x41f   : > { %v2227_v50 = vadd.f32 %v2226_v28, %v2146_v9 }
 0x420   : > { %v2233_v52 = vmul.f32 %v2231_v29, %v2225_v43 }
 0x421   : > { %v2234_v19 = vmul.f32 %v2231_v29, %v2227_v50 }
 0x422   : > { %v2239_v12 = vadd.f32 %v2237_v0, %v2233_v52 }
 0x423   : > { %v2240_v27 = vadd.f32 %v2237_v0, %v2234_v19 }
 0x424   : > { %v2241_v13 = vmax.f32 %v2239_v12, 0.0 }
 0x425   : > { %v2242_v25 = vmax.f32 %v2240_v27, 0.0 }
 0x427   : > { %v2245_v58 = vcombine.low %v2241_v13, %v2242_v25  ;;  %v2248_v63 = vcombine.high %v2241_v13, %v2242_v25 }
 0x429   : > { %2247 = vst [vmem:[%s327_s11] sm:$0xff] %v2245_v58  ;;  %2250 = vst [vmem:[%s334_s16] sm:$0xff] %v2248_v63 }
 0x42a   : > { %2738 = shalt.err (!%p2735_p10)
}
 0x42b   : > { %s2739_s12 = scalar_lea.hbm %s3794_s17, 128  ;;  %s2743_s22 = scalar_lea.hbm %s3873_s6, 256 }
 0x42c   : > { %p2740_p2 = scmp.ne.s32.totalorder %s3794_s17, %s2739_s12  ;;  %p2744_p6 = scmp.lt.u32.totalorder %s3794_s17, %s3873_s6 }
 0x42d   : > { %p2745_p8 = scmp.lt.u32.totalorder %s2743_s22, %s2739_s12  ;;  %p2747_p11 = scmp.lt.u32.totalorder %s2739_s12, %s3794_s17 }
 0x42e   : > { %p2741_p1 = pnand %p2740_p2, %p3951_p13 }
 0x42f   : > { %p2746_p9 = por %p2745_p8, %p2744_p6 }
 0x430   : > { %p2742_p4 = pneg %p2741_p1 }
 0x431   : > { %p2748_p7 = por %p2747_p11, %p2746_p9 }
 0x433   : > { %p2749_p0 = pnand %p2748_p7, %p2742_p4 }
 0x435   : > { %2752 = shalt.err (!%p2749_p0)
}
 0x436   : > { %2487 = dma.vmem_to_hbm [thread:$0]  (%p3951_p13), %s3796_s15, 128, %s3794_s17, %s2252_s29  }
 0x437   : > { %s2257_s23 = scalar_lea.sflag [#allocation9], %s3023_s18  ;;  %s2753_s10 = scalar_lea.vmem %s3803_s14, 128 }
 0x438   : > { %p2754_p3 = scmp.ne.s32.totalorder %s3803_s14, %s2753_s10  ;;  %s2850_s30 = smov [#allocation8]  }
 0x439   : > { %s2757_s12 = sshll.u32 %s2850_s30, 4  ;;  %s2758_s12 = int_to_ptr.vmem [resolvable:$false] %s2757_s12 }
 0x43a   : > { %p2755_p12 = pnand %p2754_p3, %p3951_p13  ;;  %s2759_s11 = scalar_lea.vmem %s2758_s12, 256 }
 0x43b   : > { %p2760_p10 = scmp.lt.s32.totalorder %s3803_s14, %s2758_s12  ;;  %p2761_p2 = scmp.lt.s32.totalorder %s2759_s11, %s2753_s10 }
 0x43c   : > { %p2756_p5 = pneg %p2755_p12 }
 0x43d   : > { %p2762_p1 = por %p2761_p2, %p2760_p10 }
 0x43f   : > { %p2763_p4 = pnand %p2762_p1, %p2756_p5 }
 0x441   : > { %2766 = shalt.err (!%p2763_p4)
}
 0x442   : > { %s2767_s18 = scalar_lea.hbm %s3801_s28, 128  ;;  %s2771_s29 = scalar_lea.hbm %s3874_s7, 256 }
 0x443   : > { %p2768_p6 = scmp.ne.s32.totalorder %s3801_s28, %s2767_s18  ;;  %p2772_p11 = scmp.lt.u32.totalorder %s3801_s28, %s3874_s7 }
 0x444   : > { %p2773_p7 = scmp.lt.u32.totalorder %s2771_s29, %s2767_s18  ;;  %p2775_p3 = scmp.lt.u32.totalorder %s2767_s18, %s3801_s28 }
 0x445   : > { %p2769_p8 = pnand %p2768_p6, %p3951_p13 }
 0x446   : > { %p2774_p0 = por %p2773_p7, %p2772_p11 }
 0x447   : > { %p2770_p9 = pneg %p2769_p8 }
 0x448   : > { %p2776_p12 = por %p2775_p3, %p2774_p0 }
 0x44a   : > { %p2777_p5 = pnand %p2776_p12, %p2770_p9 }
 0x44c   : > { %2780 = shalt.err (!%p2777_p5)
}
 0x44d   : > { %2488 = dma.vmem_to_hbm [thread:$0]  (%p3951_p13), %s3803_s14, 128, %s3801_s28, %s2257_s23  }
 0x44e PF: > { %s2297_s19 = sand.u32 1, %s2815_s24   ;;  %p3952_p10 = scmp.ne.s32.totalorder %s3885_s8, 0 }
 0x44f   : > { %p3953_p2 = scmp.ge.s32.totalorder %s2827_s27, 2  ;;  %s2298_s9 = scalar_lea.sflag [#allocation4], %s2297_s19 }
 0x451   : > { %p2500_p1 = pnand %p3953_p2, %p3952_p10 }
 0x453   : > { %2806 = dma.done.wait (!%p2500_p1), %s2298_s9, 128  }
 0x454   : > { %2808 = vsyncadd (!%p2500_p1), %s2298_s9, 4294967168  ;;  %s2307_s10 = scalar_lea.sflag [#allocation9], %s2297_s19 }
 0x455   : > { %2810 = dma.done.wait (!%p2500_p1), %s2307_s10, 128  }
 0x456   : > { %2812 = vsyncadd (!%p2500_p1), %s2307_s10, 4294967168  ;;  %p25_p13 = scmp.ge.s32.totalorder %s2942_s13, 4   ;;  %s3954_s24 = smov %s2819_s25 }
 0x457   : > { %s3955_s25 = smov %s2823_s26  ;;  %s3956_s26 = smov %s2966_s20 }
 0x458   : > { %s3957_s27 = smov %s2942_s13  ;;  %27 = sbr.rel (!%p25_p13) target bundleno = 8 (0x8), region = 114 }
 0x45f   :  { %2312 = vsyncpa [#allocation3], 1 }
 0x460   :  { %2314 = vsyncpa [#allocation3 + $0x1], 1 }
 0x461   :  { %2315 = vsyncpa [#allocation4], 1 }
 0x462   :  { %2317 = vsyncpa [#allocation4 + $0x1], 1 }
 0x463   :  { %2318 = vsyncpa [#allocation9], 1 }
 0x464   :  { %2320 = vsyncpa [#allocation9 + $0x1], 1 }
 0x465   :  { %2321 = vsyncpa [#allocation5], 1 }
 0x466   :  { %2323 = vsyncpa [#allocation5 + $0x1], 1 }

</bundles_post_ra>
